<compile_context>
chip_gen: v5e
topology: v5e:2x2
jax: 0.10.0
libtpu: 0.0.40
codegen_flags: <defaults>
</compile_context>

<pallas_src>
import functools

import jax
import jax.numpy as jnp
import numpy as np
from jax.experimental import pallas as pl
from jax.experimental.pallas import tpu as pltpu

NUM_ATOM_TYPE = 119
NUM_CHIRALITY_TAG = 3
NUM_BOND_TYPE = 5          # GTConv in_channels (4 bond types + self loop)
NUM_BOND_DIRECTION = 3
NUM_EDGE_SLABS = 4         # dense A slabs actually streamed to the kernel

LANE = 128


def _round_up(x, m):
  return ((x + m - 1) // m) * m


def _vmem_limit_bytes(E, Np, Gp, w_out):
  f32 = 4
  a_bytes = 2 * E * Np * Np * f32          # A stack (allow double buffering)
  work = 4 * Np * Np * f32                 # H + mix temporaries + diag mask
  small = 2 * (w_out * Np + Np * Gp + 2 * w_out * Gp + 4 * w_out) * f32
  est = a_bytes + work + small + (4 << 20)
  # Clamp into a range valid on every generation (v7x has only 64 MiB physical
  # VMEM; realistic-N runs need the tiled variant anyway -- see TODO above).
  return int(min(max(est, 32 << 20), 56 << 20))


# ----------------------------------------------------------------------------
# Fused kernel: one grid step == one GT channel c; output accumulated over c.
# ----------------------------------------------------------------------------
def gtn_fused_kernel(f_ref, A_ref, hwT_ref, b_ref, PT_ref, Wl_ref, lb_ref,
                     out_ref, *, num_layers, num_channels, n_real, mm_dtype):
  c = pl.program_id(0)
  E = A_ref.shape[0]            # 4: identity slab folded analytically
  Np = A_ref.shape[1]

  def mix4(row):
    """sum_{e<4} softmax(W)[c, e] * A[e]  (GTConv == coalesce-add, dense)."""
    acc = f_ref[row, 0] * A_ref[0]
    for e in range(1, E):                        # E = 4, static unroll
      acc = acc + f_ref[row, e] * A_ref[e]
    return acc

  def rownorm(Hc):
    """GTN.normalization: D^{-1} H with 1/0 -> 0 (matches deg_inv[inf]=0)."""
    deg = jnp.sum(Hc, axis=1, keepdims=True)
    dinv = jnp.where(deg == 0.0, 0.0, pl.reciprocal(deg, approx=True))
    return Hc * dinv

  def mm(a, b):
    return jnp.dot(a.astype(mm_dtype), b.astype(mm_dtype),
                   preferred_element_type=jnp.float32)

  # Self-loop identity, restricted to the n_real un-padded nodes (padded
  # rows/cols of everything stay exactly zero -> rownorm maps them to zero).
  rows = jax.lax.broadcasted_iota(jnp.int32, (Np, Np), 0)
  cols = jax.lax.broadcasted_iota(jnp.int32, (Np, Np), 1)
  diag = jnp.where((rows == cols) & (rows < n_real), 1.0, 0.0)

  # ---- GTLayer(first=True): H = rownorm((f1.A + f1_I I) @ (f2.A + f2_I I)) --
  r1 = c
  r2 = num_channels + c
  Ac = mix4(r1) + f_ref[r1, E] * diag
  Bc = mix4(r2) + f_ref[r2, E] * diag
  H = rownorm(mm(Ac, Bc))

  # ---- GTLayer(first=False), layers 1..L-1: H @ (B4 + f_I I) = H@B4 + f_I·H -
  for l in range(1, num_layers):
    rl = (1 + l) * num_channels + c
    B4 = mix4(rl)
    H = rownorm(mm(H, B4) + f_ref[rl, E] * H)

  # ---- GCNConv (per channel): X_c = relu(H^T (h W) + b), computed transposed
  # so the big (Np,Np) operand is a plain last-dim x first-dim MXU contraction.
  XcT = jnp.maximum(mm(hwT_ref[...], H) + b_ref[...], 0.0)        # (w_out, Np)

  # ---- global_mean_pool + this channel's slice of the final nn.Linear -------
  PXcT = mm(XcT, PT_ref[...])                                     # (w_out, Gp)
  contrib = mm(Wl_ref[0], PXcT)                                   # (w_out, Gp)

  @pl.when(c == 0)
  def _():
    out_ref[...] = jnp.zeros_like(out_ref)

  out_ref[...] += contrib                    # in-kernel cross-channel reduce

  @pl.when(c == num_channels - 1)
  def _():
    out_ref[...] += lb_ref[...]              # linear bias, broadcast over Gp


# ----------------------------------------------------------------------------
# GTN forward (thin JAX glue around one fused pallas_call)
# ----------------------------------------------------------------------------
def gtn_forward(params, A_stack4, h, batch, num_graphs, num_layers,
                mm_dtype=jnp.bfloat16):
  C = params["gt_w1_0"].shape[0]
  E, N, _ = A_stack4.shape                       # E = 4 real bond-type slabs
  w_in, w_out = params["gcn_W"].shape

  Np = _round_up(N, LANE)                        # lane/sublane aligned nodes
  Gp = _round_up(num_graphs, LANE)               # lane-dense output lane dim

  # Softmaxed GTConv filters for all layers, stacked row-wise:
  #   rows [0,C): layer0.conv1, rows [C,2C): layer0.conv2,
  #   rows [(1+l)C, (2+l)C): layer l conv1 (l >= 1).  Column 4 = self-loop coef.
  f_list = [jax.nn.softmax(params["gt_w1_0"], axis=1),
            jax.nn.softmax(params["gt_w2_0"], axis=1)]
  for l in range(1, num_layers):
    f_list.append(jax.nn.softmax(params["gt_w_%d" % l], axis=1))
  filters = jnp.concatenate(f_list, axis=0)                  # ((L+1)*C, 5)

  # Zero-padded adjacency stack (identity slab NOT included -> 20% less HBM).
  A_pad = jnp.zeros((E, Np, Np), jnp.float32).at[:, :N, :N].set(A_stack4)

  # Hoisted GCN input transform: computed ONCE, transposed & zero-padded.
  hw = h @ params["gcn_W"]                                   # (N, w_out)
  hwT = jnp.zeros((w_out, Np), jnp.float32).at[:, :N].set(hw.T)
  b_col = params["gcn_b"].reshape(w_out, 1)

  # Dense mean-pool matrix, transposed and lane-padded: (Np, Gp).
  onehot = (batch[None, :] == jnp.arange(num_graphs)[:, None]).astype(jnp.float32)
  counts = jnp.maximum(onehot.sum(axis=1, keepdims=True), 1.0)
  PT = jnp.zeros((Np, Gp), jnp.float32).at[:N, :num_graphs].set((onehot / counts).T)

  # Per-channel slices of the final Linear, un-transposed: (C, w_out, w_out).
  Wl3 = params["lin_W"].reshape(w_out, C, w_out).transpose(1, 0, 2)
  lb_col = params["lin_b"].reshape(w_out, 1)

  # NOTE: all grid-invariant inputs use constant index_maps so the pipeliner
  # does not re-fetch them across the C axis; at large N they should also be
  # single-buffered / tiled (see TODO at top of file).
  outT = pl.pallas_call(
      functools.partial(gtn_fused_kernel, num_layers=num_layers,
                        num_channels=C, n_real=N, mm_dtype=mm_dtype),
      out_shape=jax.ShapeDtypeStruct((w_out, Gp), jnp.float32),
      grid=(C,),
      in_specs=[
          pl.BlockSpec(memory_space=pltpu.MemorySpace.SMEM),      # filters
          pl.BlockSpec((E, Np, Np), lambda c: (0, 0, 0)),         # A stack
          pl.BlockSpec((w_out, Np), lambda c: (0, 0)),            # (h W)^T
          pl.BlockSpec((w_out, 1), lambda c: (0, 0)),             # gcn bias
          pl.BlockSpec((Np, Gp), lambda c: (0, 0)),               # pool P^T
          pl.BlockSpec((1, w_out, w_out), lambda c: (c, 0, 0)),   # lin_W slice
          pl.BlockSpec((w_out, 1), lambda c: (0, 0)),             # lin bias
      ],
      out_specs=pl.BlockSpec((w_out, Gp), lambda c: (0, 0)),
      compiler_params=pltpu.CompilerParams(
          # C axis must be "arbitrary": the output block is an accumulator.
          dimension_semantics=("arbitrary",),
          vmem_limit_bytes=_vmem_limit_bytes(E, Np, Gp, w_out)),
  )(filters, A_pad, hwT, b_col, PT, Wl3, lb_col)

  # Tiny XLA epilogue: drop graph padding and return (G, w_out).
  return outT[:, :num_graphs].T


# ----------------------------------------------------------------------------
# pure-JAX reference for verification (uses the full 5-slab stack, exact 1/x)
# ----------------------------------------------------------------------------
def gtn_reference(params, A_stack5, h, batch, num_graphs, num_layers):
  def rownorm(H):
    deg = H.sum(axis=2, keepdims=True)
    dinv = jnp.where(deg == 0.0, 0.0, 1.0 / deg)
    return H * dinv

  f1 = jax.nn.softmax(params["gt_w1_0"], axis=1)
  f2 = jax.nn.softmax(params["gt_w2_0"], axis=1)
  A1 = jnp.einsum("ce,enm->cnm", f1, A_stack5)
  B1 = jnp.einsum("ce,enm->cnm", f2, A_stack5)
  H = rownorm(jnp.einsum("cnk,ckm->cnm", A1, B1))
  for l in range(1, num_layers):
    f = jax.nn.softmax(params["gt_w_%d" % l], axis=1)
    B = jnp.einsum("ce,enm->cnm", f, A_stack5)
    H = rownorm(jnp.einsum("cnk,ckm->cnm", H, B))
  hw = h @ params["gcn_W"]
  X = jax.nn.relu(jnp.einsum("cnm,nf->cmf", H, hw) + params["gcn_b"][None, None, :])
  C, N, w_out = X.shape
  X_cat = jnp.transpose(X, (1, 0, 2)).reshape(N, C * w_out)
  onehot = (batch[None, :] == jnp.arange(num_graphs)[:, None]).astype(jnp.float32)
  counts = jnp.maximum(onehot.sum(axis=1, keepdims=True), 1.0)
  y = (onehot / counts) @ X_cat
  return y @ params["lin_W"].T + params["lin_b"][None, :]


# ----------------------------------------------------------------------------
if __name__ == "__main__":
  # small shapes: 16 nodes, 2 graphs, emb_dim = w_in = 32, w_out = 32,
  # num_channels = 2, num_layers = 2
  N, EMB, W_IN, W_OUT, C, L, G = 16, 32, 32, 32, 2, 2, 2
  E_PER_TYPE = 10

  key = jax.random.PRNGKey(0)
  keys = jax.random.split(key, 24)

  def xavier(k, shape):
    a = float(np.sqrt(6.0 / (shape[0] + shape[1])))
    return jax.random.uniform(k, shape, jnp.float32, -a, a)

  # synthetic graph data (data['atom'].x, per-bond-type edge_index/edge_attr)
  atom_type = jax.random.randint(keys[0], (N,), 0, NUM_ATOM_TYPE)
  chirality = jax.random.randint(keys[1], (N,), 0, NUM_CHIRALITY_TAG)
  batch = jnp.concatenate(
      [jnp.zeros(N // 2, jnp.int32), jnp.ones(N - N // 2, jnp.int32)])

  # embeddings
  x_emb1 = xavier(keys[2], (NUM_ATOM_TYPE, EMB))
  x_emb2 = xavier(keys[3], (NUM_CHIRALITY_TAG, EMB))
  e_emb1 = xavier(keys[4], (NUM_BOND_TYPE, 1))
  e_emb2 = xavier(keys[5], (NUM_BOND_DIRECTION, 1))

  # h = x_embedding1(X[:,0]) + x_embedding2(X[:,1]); 0.1*h + 0.9*h.detach()
  h = x_emb1[atom_type] + x_emb2[chirality]
  h = 0.1 * h + 0.9 * jax.lax.stop_gradient(h)

  # dense adjacency per bond type (SINGLE, DOUBLE, TRIPLE, AROMATIC)
  A_list = []
  for bt in range(4):
    ei = jax.random.randint(keys[6 + bt], (2, E_PER_TYPE), 0, N)
    direction = jax.random.randint(keys[10 + bt], (E_PER_TYPE,), 0,
                                   NUM_BOND_DIRECTION)
    vals = e_emb1[bt, 0] + e_emb2[direction, 0]
    A_b = jnp.zeros((N, N), jnp.float32).at[ei[0], ei[1]].add(vals)
    A_list.append(A_b)
  A_stack4 = jnp.stack(A_list, axis=0)                         # (4, N, N)
  A_stack5 = jnp.concatenate(                                  # (5, N, N) for ref
      [A_stack4, jnp.eye(N, dtype=jnp.float32)[None]], axis=0)

  # GTN parameters (deterministic init per __init__ shapes)
  params = {
      "gt_w1_0": 0.01 * jax.random.normal(keys[14], (C, NUM_BOND_TYPE)),
      "gt_w2_0": 0.01 * jax.random.normal(keys[15], (C, NUM_BOND_TYPE)),
      "gcn_W": xavier(keys[16], (W_IN, W_OUT)),
      "gcn_b": 0.01 * jax.random.normal(keys[17], (W_OUT,)),
      "lin_W": xavier(keys[18], (W_OUT, C * W_OUT)),
      "lin_b": 0.01 * jax.random.normal(keys[19], (W_OUT,)),
  }
  for l in range(1, L):
    params["gt_w_%d" % l] = 0.01 * jax.random.normal(keys[20 + l - 1],
                                                     (C, NUM_BOND_TYPE))

  # f32-MXU path: strict-ish check vs the exact fp32 reference (tolerance
  # loosened slightly for the approx-reciprocal EUP rownorm).
  out = gtn_forward(params, A_stack4, h, batch, G, L, mm_dtype=jnp.float32)
  out = jax.block_until_ready(out)
  ref = jax.block_until_ready(gtn_reference(params, A_stack5, h, batch, G, L))
  np.testing.assert_allclose(np.asarray(out), np.asarray(ref),
                             rtol=2e-2, atol=2e-3)

  # bf16 MXU fast path (default mm_dtype, perf review item): exercise
  # compile + run; accuracy of the L-deep rownormed chain is workload-
  # dependent, so no tight assert here.
  out_bf16 = jax.block_until_ready(
      gtn_forward(params, A_stack4, h, batch, G, L, mm_dtype=jnp.bfloat16))
  assert out_bf16.shape == (G, W_OUT)

  # TODO(synk): GCNConv class is not included in the source; we follow the
  # original GTN repo convention (out = H^T (xW) + b). Flip the contraction
  # axis if the checkpointed GCNConv aggregates along the other direction.
  print("KERNEL_OK")
</pallas_src>

<mosaic_0001>
module attributes {stable_mosaic.version = 11 : i64} {
  func.func @gtn_fused_kernel(%arg0: i32, %arg1: memref<6x5xf32, #tpu.memory_space<smem>>, %arg2: memref<4x128x128xf32, #tpu.memory_space<vmem>>, %arg3: memref<32x128xf32, #tpu.memory_space<vmem>>, %arg4: memref<32x1xf32, #tpu.memory_space<vmem>>, %arg5: memref<128x128xf32, #tpu.memory_space<vmem>>, %arg6: memref<1x32x32xf32, #tpu.memory_space<vmem>>, %arg7: memref<32x1xf32, #tpu.memory_space<vmem>>, %arg8: memref<32x128xf32, #tpu.memory_space<vmem>>) attributes {dimension_semantics = [#tpu.dimension_semantics<arbitrary>], iteration_bounds = array<i64: 2>, scalar_prefetch = 0 : i64, scratch_operands = 0 : i64, tpu.core_type = #tpu.core_type<tc>, window_params = [{transform_indices = @transform_0, window_bounds = array<i64: 6, 5>}, {pipeline_mode = #tpu.pipeline_mode<synchronous>, transform_indices = @transform_1, window_bounds = array<i64: 4, 128, 128>}, {pipeline_mode = #tpu.pipeline_mode<synchronous>, transform_indices = @transform_2, window_bounds = array<i64: 32, 128>}, {pipeline_mode = #tpu.pipeline_mode<synchronous>, transform_indices = @transform_3, window_bounds = array<i64: 32, 1>}, {pipeline_mode = #tpu.pipeline_mode<synchronous>, transform_indices = @transform_4, window_bounds = array<i64: 128, 128>}, {transform_indices = @transform_5, window_bounds = array<i64: 1, 32, 32>}, {pipeline_mode = #tpu.pipeline_mode<synchronous>, transform_indices = @transform_6, window_bounds = array<i64: 32, 1>}, {pipeline_mode = #tpu.pipeline_mode<synchronous>, transform_indices = @transform_7, window_bounds = array<i64: 32, 128>}]} {
    %0 = tpu.iota {dimensions = array<i32: 0>} : vector<128x128xi32>
    %1 = tpu.iota {dimensions = array<i32: 1>} : vector<128x128xi32>
    %2 = arith.cmpi eq, %0, %1 : vector<128x128xi32>
    %c16_i32 = arith.constant 16 : i32
    %3 = vector.broadcast %c16_i32 : i32 to vector<128x128xi32>
    %4 = arith.cmpi slt, %0, %3 : vector<128x128xi32>
    %5 = arith.andi %2, %4 : vector<128x128xi1>
    %cst = arith.constant 1.000000e+00 : f32
    %cst_0 = arith.constant 0.000000e+00 : f32
    %6 = vector.broadcast %cst : f32 to vector<128x128xf32>
    %7 = vector.broadcast %cst_0 : f32 to vector<128x128xf32>
    %8 = arith.select %5, %6, %7 : vector<128x128xi1>, vector<128x128xf32>
    %c2_i32 = arith.constant 2 : i32
    %9 = arith.addi %c2_i32, %arg0 : i32
    %10 = arith.index_cast %arg0 : i32 to index
    %c0 = arith.constant 0 : index
    %11 = memref.load %arg1[%10, %c0] : memref<6x5xf32, #tpu.memory_space<smem>>
    %c0_1 = arith.constant 0 : index
    %c0_2 = arith.constant 0 : index
    %c0_3 = arith.constant 0 : index
    %12 = vector.load %arg2[%c0_1, %c0_2, %c0_3] : memref<4x128x128xf32, #tpu.memory_space<vmem>>, vector<1x128x128xf32>
    %13 = vector.shape_cast %12 : vector<1x128x128xf32> to vector<128x128xf32>
    %14 = vector.broadcast %11 : f32 to vector<128x128xf32>
    %15 = arith.mulf %14, %13 : vector<128x128xf32>
    %16 = arith.index_cast %arg0 : i32 to index
    %c1 = arith.constant 1 : index
    %17 = memref.load %arg1[%16, %c1] : memref<6x5xf32, #tpu.memory_space<smem>>
    %c1_4 = arith.constant 1 : index
    %c0_5 = arith.constant 0 : index
    %c0_6 = arith.constant 0 : index
    %18 = vector.load %arg2[%c1_4, %c0_5, %c0_6] : memref<4x128x128xf32, #tpu.memory_space<vmem>>, vector<1x128x128xf32>
    %19 = vector.shape_cast %18 : vector<1x128x128xf32> to vector<128x128xf32>
    %20 = vector.broadcast %17 : f32 to vector<128x128xf32>
    %21 = arith.mulf %20, %19 : vector<128x128xf32>
    %22 = arith.addf %15, %21 : vector<128x128xf32>
    %23 = arith.index_cast %arg0 : i32 to index
    %c2 = arith.constant 2 : index
    %24 = memref.load %arg1[%23, %c2] : memref<6x5xf32, #tpu.memory_space<smem>>
    %c2_7 = arith.constant 2 : index
    %c0_8 = arith.constant 0 : index
    %c0_9 = arith.constant 0 : index
    %25 = vector.load %arg2[%c2_7, %c0_8, %c0_9] : memref<4x128x128xf32, #tpu.memory_space<vmem>>, vector<1x128x128xf32>
    %26 = vector.shape_cast %25 : vector<1x128x128xf32> to vector<128x128xf32>
    %27 = vector.broadcast %24 : f32 to vector<128x128xf32>
    %28 = arith.mulf %27, %26 : vector<128x128xf32>
    %29 = arith.addf %22, %28 : vector<128x128xf32>
    %30 = arith.index_cast %arg0 : i32 to index
    %c3 = arith.constant 3 : index
    %31 = memref.load %arg1[%30, %c3] : memref<6x5xf32, #tpu.memory_space<smem>>
    %c3_10 = arith.constant 3 : index
    %c0_11 = arith.constant 0 : index
    %c0_12 = arith.constant 0 : index
    %32 = vector.load %arg2[%c3_10, %c0_11, %c0_12] : memref<4x128x128xf32, #tpu.memory_space<vmem>>, vector<1x128x128xf32>
    %33 = vector.shape_cast %32 : vector<1x128x128xf32> to vector<128x128xf32>
    %34 = vector.broadcast %31 : f32 to vector<128x128xf32>
    %35 = arith.mulf %34, %33 : vector<128x128xf32>
    %36 = arith.addf %29, %35 : vector<128x128xf32>
    %37 = arith.index_cast %arg0 : i32 to index
    %c4 = arith.constant 4 : index
    %38 = memref.load %arg1[%37, %c4] : memref<6x5xf32, #tpu.memory_space<smem>>
    %39 = vector.broadcast %38 : f32 to vector<128x128xf32>
    %40 = arith.mulf %39, %8 : vector<128x128xf32>
    %41 = arith.addf %36, %40 : vector<128x128xf32>
    %42 = arith.index_cast %9 : i32 to index
    %c0_13 = arith.constant 0 : index
    %43 = memref.load %arg1[%42, %c0_13] : memref<6x5xf32, #tpu.memory_space<smem>>
    %c0_14 = arith.constant 0 : index
    %c0_15 = arith.constant 0 : index
    %c0_16 = arith.constant 0 : index
    %44 = vector.load %arg2[%c0_14, %c0_15, %c0_16] : memref<4x128x128xf32, #tpu.memory_space<vmem>>, vector<1x128x128xf32>
    %45 = vector.shape_cast %44 : vector<1x128x128xf32> to vector<128x128xf32>
    %46 = vector.broadcast %43 : f32 to vector<128x128xf32>
    %47 = arith.mulf %46, %45 : vector<128x128xf32>
    %48 = arith.index_cast %9 : i32 to index
    %c1_17 = arith.constant 1 : index
    %49 = memref.load %arg1[%48, %c1_17] : memref<6x5xf32, #tpu.memory_space<smem>>
    %c1_18 = arith.constant 1 : index
    %c0_19 = arith.constant 0 : index
    %c0_20 = arith.constant 0 : index
    %50 = vector.load %arg2[%c1_18, %c0_19, %c0_20] : memref<4x128x128xf32, #tpu.memory_space<vmem>>, vector<1x128x128xf32>
    %51 = vector.shape_cast %50 : vector<1x128x128xf32> to vector<128x128xf32>
    %52 = vector.broadcast %49 : f32 to vector<128x128xf32>
    %53 = arith.mulf %52, %51 : vector<128x128xf32>
    %54 = arith.addf %47, %53 : vector<128x128xf32>
    %55 = arith.index_cast %9 : i32 to index
    %c2_21 = arith.constant 2 : index
    %56 = memref.load %arg1[%55, %c2_21] : memref<6x5xf32, #tpu.memory_space<smem>>
    %c2_22 = arith.constant 2 : index
    %c0_23 = arith.constant 0 : index
    %c0_24 = arith.constant 0 : index
    %57 = vector.load %arg2[%c2_22, %c0_23, %c0_24] : memref<4x128x128xf32, #tpu.memory_space<vmem>>, vector<1x128x128xf32>
    %58 = vector.shape_cast %57 : vector<1x128x128xf32> to vector<128x128xf32>
    %59 = vector.broadcast %56 : f32 to vector<128x128xf32>
    %60 = arith.mulf %59, %58 : vector<128x128xf32>
    %61 = arith.addf %54, %60 : vector<128x128xf32>
    %62 = arith.index_cast %9 : i32 to index
    %c3_25 = arith.constant 3 : index
    %63 = memref.load %arg1[%62, %c3_25] : memref<6x5xf32, #tpu.memory_space<smem>>
    %c3_26 = arith.constant 3 : index
    %c0_27 = arith.constant 0 : index
    %c0_28 = arith.constant 0 : index
    %64 = vector.load %arg2[%c3_26, %c0_27, %c0_28] : memref<4x128x128xf32, #tpu.memory_space<vmem>>, vector<1x128x128xf32>
    %65 = vector.shape_cast %64 : vector<1x128x128xf32> to vector<128x128xf32>
    %66 = vector.broadcast %63 : f32 to vector<128x128xf32>
    %67 = arith.mulf %66, %65 : vector<128x128xf32>
    %68 = arith.addf %61, %67 : vector<128x128xf32>
    %69 = arith.index_cast %9 : i32 to index
    %c4_29 = arith.constant 4 : index
    %70 = memref.load %arg1[%69, %c4_29] : memref<6x5xf32, #tpu.memory_space<smem>>
    %71 = vector.broadcast %70 : f32 to vector<128x128xf32>
    %72 = arith.mulf %71, %8 : vector<128x128xf32>
    %73 = arith.addf %68, %72 : vector<128x128xf32>
    %cst_30 = arith.constant dense<0.000000e+00> : vector<128x128xf32>
    %74 = tpu.matmul %41, %73, %cst_30 {dimension_numbers = #tpu.dot_dimension_numbers<[1], [0], [0], [1], [0, 0, 1, 1], [], []>} : vector<128x128xf32>, vector<128x128xf32>, vector<128x128xf32> -> vector<128x128xf32>
    %cst_31 = arith.constant dense<0.000000e+00> : vector<128xf32>
    %75 = vector.multi_reduction <add>, %74, %cst_31 [1] : vector<128x128xf32> to vector<128xf32>
    %76 = vector.shape_cast %75 : vector<128xf32> to vector<128x1xf32>
    %cst_32 = arith.constant 0.000000e+00 : f32
    %77 = vector.broadcast %cst_32 : f32 to vector<128x1xf32>
    %78 = arith.cmpf oeq, %76, %77 : vector<128x1xf32>
    %79 = tpu.reciprocal %76 {approx = true} : vector<128x1xf32> -> vector<128x1xf32>
    %cst_33 = arith.constant 0.000000e+00 : f32
    %80 = vector.broadcast %cst_33 : f32 to vector<128x1xf32>
    %81 = arith.select %78, %80, %79 : vector<128x1xi1>, vector<128x1xf32>
    %82 = vector.broadcast %81 : vector<128x1xf32> to vector<128x128xf32>
    %83 = arith.mulf %74, %82 : vector<128x128xf32>
    %c4_i32 = arith.constant 4 : i32
    %84 = arith.addi %c4_i32, %arg0 : i32
    %85 = arith.index_cast %84 : i32 to index
    %c0_34 = arith.constant 0 : index
    %86 = memref.load %arg1[%85, %c0_34] : memref<6x5xf32, #tpu.memory_space<smem>>
    %c0_35 = arith.constant 0 : index
    %c0_36 = arith.constant 0 : index
    %c0_37 = arith.constant 0 : index
    %87 = vector.load %arg2[%c0_35, %c0_36, %c0_37] : memref<4x128x128xf32, #tpu.memory_space<vmem>>, vector<1x128x128xf32>
    %88 = vector.shape_cast %87 : vector<1x128x128xf32> to vector<128x128xf32>
    %89 = vector.broadcast %86 : f32 to vector<128x128xf32>
    %90 = arith.mulf %89, %88 : vector<128x128xf32>
    %91 = arith.index_cast %84 : i32 to index
    %c1_38 = arith.constant 1 : index
    %92 = memref.load %arg1[%91, %c1_38] : memref<6x5xf32, #tpu.memory_space<smem>>
    %c1_39 = arith.constant 1 : index
    %c0_40 = arith.constant 0 : index
    %c0_41 = arith.constant 0 : index
    %93 = vector.load %arg2[%c1_39, %c0_40, %c0_41] : memref<4x128x128xf32, #tpu.memory_space<vmem>>, vector<1x128x128xf32>
    %94 = vector.shape_cast %93 : vector<1x128x128xf32> to vector<128x128xf32>
    %95 = vector.broadcast %92 : f32 to vector<128x128xf32>
    %96 = arith.mulf %95, %94 : vector<128x128xf32>
    %97 = arith.addf %90, %96 : vector<128x128xf32>
    %98 = arith.index_cast %84 : i32 to index
    %c2_42 = arith.constant 2 : index
    %99 = memref.load %arg1[%98, %c2_42] : memref<6x5xf32, #tpu.memory_space<smem>>
    %c2_43 = arith.constant 2 : index
    %c0_44 = arith.constant 0 : index
    %c0_45 = arith.constant 0 : index
    %100 = vector.load %arg2[%c2_43, %c0_44, %c0_45] : memref<4x128x128xf32, #tpu.memory_space<vmem>>, vector<1x128x128xf32>
    %101 = vector.shape_cast %100 : vector<1x128x128xf32> to vector<128x128xf32>
    %102 = vector.broadcast %99 : f32 to vector<128x128xf32>
    %103 = arith.mulf %102, %101 : vector<128x128xf32>
    %104 = arith.addf %97, %103 : vector<128x128xf32>
    %105 = arith.index_cast %84 : i32 to index
    %c3_46 = arith.constant 3 : index
    %106 = memref.load %arg1[%105, %c3_46] : memref<6x5xf32, #tpu.memory_space<smem>>
    %c3_47 = arith.constant 3 : index
    %c0_48 = arith.constant 0 : index
    %c0_49 = arith.constant 0 : index
    %107 = vector.load %arg2[%c3_47, %c0_48, %c0_49] : memref<4x128x128xf32, #tpu.memory_space<vmem>>, vector<1x128x128xf32>
    %108 = vector.shape_cast %107 : vector<1x128x128xf32> to vector<128x128xf32>
    %109 = vector.broadcast %106 : f32 to vector<128x128xf32>
    %110 = arith.mulf %109, %108 : vector<128x128xf32>
    %111 = arith.addf %104, %110 : vector<128x128xf32>
    %cst_50 = arith.constant dense<0.000000e+00> : vector<128x128xf32>
    %112 = tpu.matmul %83, %111, %cst_50 {dimension_numbers = #tpu.dot_dimension_numbers<[1], [0], [0], [1], [0, 0, 1, 1], [], []>} : vector<128x128xf32>, vector<128x128xf32>, vector<128x128xf32> -> vector<128x128xf32>
    %113 = arith.index_cast %84 : i32 to index
    %c4_51 = arith.constant 4 : index
    %114 = memref.load %arg1[%113, %c4_51] : memref<6x5xf32, #tpu.memory_space<smem>>
    %115 = vector.broadcast %114 : f32 to vector<128x128xf32>
    %116 = arith.mulf %115, %83 : vector<128x128xf32>
    %117 = arith.addf %112, %116 : vector<128x128xf32>
    %cst_52 = arith.constant dense<0.000000e+00> : vector<128xf32>
    %118 = vector.multi_reduction <add>, %117, %cst_52 [1] : vector<128x128xf32> to vector<128xf32>
    %119 = vector.shape_cast %118 : vector<128xf32> to vector<128x1xf32>
    %cst_53 = arith.constant 0.000000e+00 : f32
    %120 = vector.broadcast %cst_53 : f32 to vector<128x1xf32>
    %121 = arith.cmpf oeq, %119, %120 : vector<128x1xf32>
    %122 = tpu.reciprocal %119 {approx = true} : vector<128x1xf32> -> vector<128x1xf32>
    %cst_54 = arith.constant 0.000000e+00 : f32
    %123 = vector.broadcast %cst_54 : f32 to vector<128x1xf32>
    %124 = arith.select %121, %123, %122 : vector<128x1xi1>, vector<128x1xf32>
    %125 = vector.broadcast %124 : vector<128x1xf32> to vector<128x128xf32>
    %126 = arith.mulf %117, %125 : vector<128x128xf32>
    %c0_55 = arith.constant 0 : index
    %c0_56 = arith.constant 0 : index
    %127 = vector.load %arg3[%c0_55, %c0_56] : memref<32x128xf32, #tpu.memory_space<vmem>>, vector<32x128xf32>
    %cst_57 = arith.constant dense<0.000000e+00> : vector<32x128xf32>
    %128 = tpu.matmul %127, %126, %cst_57 {dimension_numbers = #tpu.dot_dimension_numbers<[1], [0], [0], [1], [0, 0, 1, 1], [], []>} : vector<32x128xf32>, vector<128x128xf32>, vector<32x128xf32> -> vector<32x128xf32>
    %c0_58 = arith.constant 0 : index
    %c0_59 = arith.constant 0 : index
    %129 = vector.load %arg4[%c0_58, %c0_59] : memref<32x1xf32, #tpu.memory_space<vmem>>, vector<32x1xf32>
    %130 = vector.broadcast %129 : vector<32x1xf32> to vector<32x128xf32>
    %131 = arith.addf %128, %130 : vector<32x128xf32>
    %cst_60 = arith.constant 0.000000e+00 : f32
    %132 = vector.broadcast %cst_60 : f32 to vector<32x128xf32>
    %133 = arith.maximumf %131, %132 : vector<32x128xf32>
    %c0_61 = arith.constant 0 : index
    %c0_62 = arith.constant 0 : index
    %134 = vector.load %arg5[%c0_61, %c0_62] : memref<128x128xf32, #tpu.memory_space<vmem>>, vector<128x128xf32>
    %cst_63 = arith.constant dense<0.000000e+00> : vector<32x128xf32>
    %135 = tpu.matmul %133, %134, %cst_63 {dimension_numbers = #tpu.dot_dimension_numbers<[1], [0], [0], [1], [0, 0, 1, 1], [], []>} : vector<32x128xf32>, vector<128x128xf32>, vector<32x128xf32> -> vector<32x128xf32>
    %c0_64 = arith.constant 0 : index
    %c0_65 = arith.constant 0 : index
    %c0_66 = arith.constant 0 : index
    %136 = vector.load %arg6[%c0_64, %c0_65, %c0_66] : memref<1x32x32xf32, #tpu.memory_space<vmem>>, vector<1x32x32xf32>
    %137 = vector.shape_cast %136 : vector<1x32x32xf32> to vector<32x32xf32>
    %cst_67 = arith.constant dense<0.000000e+00> : vector<32x128xf32>
    %138 = tpu.matmul %137, %135, %cst_67 {dimension_numbers = #tpu.dot_dimension_numbers<[1], [0], [0], [1], [0, 0, 1, 1], [], []>} : vector<32x32xf32>, vector<32x128xf32>, vector<32x128xf32> -> vector<32x128xf32>
    %c0_i32 = arith.constant 0 : i32
    %139 = arith.cmpi eq, %arg0, %c0_i32 : i32
    %140 = arith.extui %139 : i1 to i32
    %c0_i32_68 = arith.constant 0 : i32
    %141 = arith.cmpi ne, %140, %c0_i32_68 : i32
    scf.if %141 {
      %cst_74 = arith.constant 0.000000e+00 : f32
      %148 = vector.broadcast %cst_74 : f32 to vector<32x128xf32>
      %c0_75 = arith.constant 0 : index
      %c0_76 = arith.constant 0 : index
      %149 = vector.load %arg8[%c0_75, %c0_76] : memref<32x128xf32, #tpu.memory_space<vmem>>, vector<32x128xf32>
      tpu.vector_store %arg8[%c0_75, %c0_76], %148 {strides = array<i32>} : memref<32x128xf32, #tpu.memory_space<vmem>>, vector<32x128xf32>,
    } else {
    }
    %c0_69 = arith.constant 0 : index
    %c0_70 = arith.constant 0 : index
    %142 = vector.load %arg8[%c0_69, %c0_70] : memref<32x128xf32, #tpu.memory_space<vmem>>, vector<32x128xf32>
    %143 = arith.addf %142, %138 : vector<32x128xf32>
    %c0_71 = arith.constant 0 : index
    %c0_72 = arith.constant 0 : index
    %144 = vector.load %arg8[%c0_71, %c0_72] : memref<32x128xf32, #tpu.memory_space<vmem>>, vector<32x128xf32>
    tpu.vector_store %arg8[%c0_71, %c0_72], %143 {strides = array<i32>} : memref<32x128xf32, #tpu.memory_space<vmem>>, vector<32x128xf32>,
    %c1_i32 = arith.constant 1 : i32
    %145 = arith.cmpi eq, %arg0, %c1_i32 : i32
    %146 = arith.extui %145 : i1 to i32
    %c0_i32_73 = arith.constant 0 : i32
    %147 = arith.cmpi ne, %146, %c0_i32_73 : i32
    scf.if %147 {
      %c0_74 = arith.constant 0 : index
      %c0_75 = arith.constant 0 : index
      %148 = vector.load %arg8[%c0_74, %c0_75] : memref<32x128xf32, #tpu.memory_space<vmem>>, vector<32x128xf32>
      %c0_76 = arith.constant 0 : index
      %c0_77 = arith.constant 0 : index
      %149 = vector.load %arg7[%c0_76, %c0_77] : memref<32x1xf32, #tpu.memory_space<vmem>>, vector<32x1xf32>
      %150 = vector.broadcast %149 : vector<32x1xf32> to vector<32x128xf32>
      %151 = arith.addf %148, %150 : vector<32x128xf32>
      %c0_78 = arith.constant 0 : index
      %c0_79 = arith.constant 0 : index
      %152 = vector.load %arg8[%c0_78, %c0_79] : memref<32x128xf32, #tpu.memory_space<vmem>>, vector<32x128xf32>
      tpu.vector_store %arg8[%c0_78, %c0_79], %151 {strides = array<i32>} : memref<32x128xf32, #tpu.memory_space<vmem>>, vector<32x128xf32>,
    } else {
    }
    return
  }
  func.func @transform_0(%arg0: i32) -> (i32, i32) {
    %c0_i32 = arith.constant 0 : i32
    %c0_i32_0 = arith.constant 0 : i32
    %c0_i32_1 = arith.constant 0 : i32
    return %c0_i32, %c0_i32_0 : i32, i32
  }
  func.func @transform_1(%arg0: i32) -> (i32, i32, i32) {
    %c0_i32 = arith.constant 0 : i32
    %c0_i32_0 = arith.constant 0 : i32
    %c0_i32_1 = arith.constant 0 : i32
    %c0_i32_2 = arith.constant 0 : i32
    return %c0_i32, %c0_i32_0, %c0_i32_1 : i32, i32, i32
  }
  func.func @transform_2(%arg0: i32) -> (i32, i32) {
    %c0_i32 = arith.constant 0 : i32
    %c0_i32_0 = arith.constant 0 : i32
    %c0_i32_1 = arith.constant 0 : i32
    return %c0_i32, %c0_i32_0 : i32, i32
  }
  func.func @transform_3(%arg0: i32) -> (i32, i32) {
    %c0_i32 = arith.constant 0 : i32
    %c0_i32_0 = arith.constant 0 : i32
    %c0_i32_1 = arith.constant 0 : i32
    return %c0_i32, %c0_i32_0 : i32, i32
  }
  func.func @transform_4(%arg0: i32) -> (i32, i32) {
    %c0_i32 = arith.constant 0 : i32
    %c0_i32_0 = arith.constant 0 : i32
    %c0_i32_1 = arith.constant 0 : i32
    return %c0_i32, %c0_i32_0 : i32, i32
  }
  func.func @transform_5(%arg0: i32) -> (i32, i32, i32) {
    %c0_i32 = arith.constant 0 : i32
    %c0_i32_0 = arith.constant 0 : i32
    %c0_i32_1 = arith.constant 0 : i32
    return %arg0, %c0_i32, %c0_i32_0 : i32, i32, i32
  }
  func.func @transform_6(%arg0: i32) -> (i32, i32) {
    %c0_i32 = arith.constant 0 : i32
    %c0_i32_0 = arith.constant 0 : i32
    %c0_i32_1 = arith.constant 0 : i32
    return %c0_i32, %c0_i32_0 : i32, i32
  }
  func.func @transform_7(%arg0: i32) -> (i32, i32) {
    %c0_i32 = arith.constant 0 : i32
    %c0_i32_0 = arith.constant 0 : i32
    %c0_i32_1 = arith.constant 0 : i32
    return %c0_i32, %c0_i32_0 : i32, i32
  }
}

</mosaic_0001>

<bundles_post_ra>
// kernel: tpu_custom_call.1
= control target key start
LH: loop header
LB: loop body
LE: loop exit
PB: predicated region body
PF: predicated region fallthrough
CT: control target
= control target key end

     0   :  { %12 = vsyncpa [#allocation5], 0  ;;  %s2871_s0 = inlined_call_operand.hbm [shape: f32[6,5], index: 0, kind: input, shape index: {}]   ;;  %s2872_s1 = inlined_call_operand.hbm [shape: f32[4,128,128], index: 1, kind: input, shape index: {}]   ;;  %s2873_s2 = inlined_call_operand.hbm [shape: f32[32,128], index: 2, kind: input, shape index: {}]   ;;  %s2874_s3 = inlined_call_operand.vmem [shape: f32[32,1], index: 3, kind: input, shape index: {}]   ;;  %s2875_s4 = inlined_call_operand.hbm [shape: f32[128,128], index: 4, kind: input, shape index: {}]   ;;  %s2876_s5 = inlined_call_operand.vmem [shape: f32[2,32,32], index: 5, kind: input, shape index: {}]   ;;  %s2877_s6 = inlined_call_operand.vmem [shape: f32[32,1], index: 6, kind: input, shape index: {}]   ;;  %s2878_s7 = inlined_call_operand.hbm [shape: f32[32,128], index: 7, kind: output, shape index: {}]  }
   0x1   :  { %13 = vsyncpa [#allocation3], 0 }
   0x2   :  { %14 = vsyncpa [#allocation8], 0 }
   0x3   :  { %15 = vsyncpa [#allocation4], 0  ;;  %s1980_s24 = smov 0  }
   0x4 LB: > { %s1986_s25 = sadd.s32 4294967295, %s1925_s24   ;;  %p1570_p0 = scmp.ge.s32.totalorder %s1925_s24, 1  ;;  %s1925_s24 = sphi %s1980_s24, %s21_s24  }
   0x5   : > { %p199_p1 = scmp.lt.s32.totalorder %s1925_s24, 3  ;;  %p1571_p2 = scmp.ne.s32.totalorder %s1986_s25, 0 }
   0x6   : > { %p1670_p3 = scmp.eq.s32.totalorder %s1986_s25, 0  ;;  %s234_s28 = sshll.u32 %s2873_s2, 4  ;;  %s235_s28 = int_to_ptr.hbm [resolvable:$true] %s234_s28 }
   0x7   : > { %p1995_p4 = pnand %p1570_p0, %p199_p1  ;;  %s211_s9 = sshll.u32 %s2871_s0, 4  ;;  %s212_s9 = int_to_ptr.hbm [resolvable:$true] %s211_s9 }
   0x8   : > { %s1927_s10 = smov [#allocation7]   ;;  %s220_s15 = sshll.u32 %s2872_s1, 4  ;;  %s221_s15 = int_to_ptr.hbm [resolvable:$true] %s220_s15 }
   0x9   : > { %p1657_p5 = pneg %p1995_p4  ;;  %s236_s11 = sshll.u32 %s1927_s10, 4  ;;  %s237_s11 = int_to_ptr.vmem [resolvable:$true] %s236_s11 }
   0xa   : > { %s1928_s16 = smov 128   ;;  %s1929_s17 = smov 8  }
   0xb   : > { %p2006_p6 = pnand %p1670_p3, %p1657_p5  ;;  %s1930_s18 = smov [#allocation2]  }
   0xc   : > { %s1931_s19 = smov [#allocation6]   ;;  %s251_s23 = sshll.u32 %s2875_s4, 4  ;;  %s252_s23 = int_to_ptr.hbm [resolvable:$true] %s251_s23 }
   0xd   : > { %1666 = dma.hbm_to_vmem [thread:$0]  (!%p2006_p6), %s235_s28, 512, %s237_s11, [#allocation8], %s1928_s16, %s1928_s16, %s1929_s17  }
   0xe   : > { %1660 = dma.hbm_to_smem (!%p2006_p6), %s212_s9, 128, %s1930_s18, [#allocation5]  }
   0xf   : > { %s222_s20 = sshll.u32 %s1931_s19, 4  ;;  %s1932_s26 = smov [#allocation9]   ;;  %s223_s20 = int_to_ptr.vmem [resolvable:$true] %s222_s20 }
  0x10   : > { %1663 = dma.hbm_to_vmem [thread:$0]  (!%p2006_p6), %s221_s15, 8192, %s223_s20, [#allocation3], %s1928_s16, %s1928_s16, %s1929_s17  }
  0x11   : > { %s253_s27 = sshll.u32 %s1932_s26, 4  ;;  %280 = sbr.rel (%p1995_p4) target bundleno = 1292 (0x50c), region = 48  ;;  %s254_s27 = int_to_ptr.vmem [resolvable:$true] %s253_s27 }
  0x12   : > { %1669 = dma.hbm_to_vmem [thread:$0]  (!%p2006_p6), %s252_s23, 2048, %s254_s27, [#allocation8], %s1928_s16, %s1928_s16, %s1929_s17  }
  0x16   : > { %1908 = dma.done.wait (%p1670_p3), [#allocation5], 128  }
  0x17   : > { %1910 = vsyncadd (%p1670_p3), [#allocation5], 4294967168 }
  0x18   : > { %1912 = dma.done.wait (%p1670_p3), [#allocation3], 8192  }
  0x19   : > { %1914 = vsyncadd (%p1670_p3), [#allocation3], 4294959104 }
  0x1a   : > { %1916 = dma.done.wait (%p1670_p3), [#allocation8], 2560  }
  0x1b   : > { %1918 = vsyncadd (%p1670_p3), [#allocation8], 4294964736 }
  0x1c   : > { %302 = sfence }
  0x1d   : > { %s2039_s28 = sshll.u32 %s1986_s25, 7  ;;  %v329_v0 = vlaneseq  ;;  %v2042_v1 = vld [vmem:[#allocation6 + $0x78] sm:$0xff]  ;;  %v2046_v2 = vld [vmem:[#allocation6 + $0x70] sm:$0xff]  ;;  %v2048_v3 = vld [vmem:[#allocation6 + $0x68] sm:$0xff]  ;;  %p324_p7 = scmp.lt.s32.totalorder %s1986_s25, 1 }
  0x1e   : > { %s1598_s29 = sadd.s32 256, %s2039_s28  ;;  %2955 = vst [vmem:[#allocation15_spill] sm:$0xff] %v2042_v1  ;;  %v2052_v5 = vld [vmem:[#allocation6 + $0xf8] sm:$0xff]  ;;  %v2054_v6 = vld [vmem:[#allocation6 + $0xf0] sm:$0xff]  ;;  %v2056_v7 = vld [vmem:[#allocation6 + $0xe8] sm:$0xff]  ;;  %s448_s16 = sadd.s32 1, %s2039_s28 }
  0x1f   : > { %s640_s30 = sld [smem:[#allocation2 + %s1598_s29]]  ;;  %s658_s8 = sadd.s32 1, %s1598_s29  ;;  %v2050_v4 = vshrl.u32 %v329_v0, 7  ;;  %2956 = vst [vmem:[#allocation16_spill] sm:$0xff] %v2052_v5  ;;  %v2058_v8 = vld [vmem:[#allocation6 + $0x178] sm:$0xff]  ;;  %v2062_v10 = vld [vmem:[#allocation6 + $0x170] sm:$0xff] }
  0x20   : > { %s659_s9 = sld [smem:[#allocation2 + %s658_s8]]  ;;  %s693_s10 = sadd.s32 2, %s1598_s29  ;;  %2957 = vst [vmem:[#allocation17_spill] sm:$0xff] %v2058_v8  ;;  %v2064_v11 = vld [vmem:[#allocation6 + $0x168] sm:$0xff]  ;;  %v2069_v13 = vand.u32 127, %v329_v0  ;;  %v2071_v14 = vld [vmem:[#allocation6 + $0x1f8] sm:$0xff] }
  0x21   : > { %s694_s11 = sld [smem:[#allocation2 + %s693_s10]]  ;;  %s728_s12 = sadd.s32 3, %s1598_s29  ;;  %v2067_v12 = vadd.s32 8, %v2050_v4  ;;  %2958 = vst [vmem:[#allocation18_spill] sm:$0xff] %v2071_v14  ;;  %v2085_v21 = vld [vmem:[#allocation6 + $0x1f0] sm:$0xff]  ;;  %v2089_v23 = vld [vmem:[#allocation6 + $0x1e8] sm:$0xff] }
  0x22   : > { %s729_s13 = sld [smem:[#allocation2 + %s728_s12]]  ;;  %s763_s14 = sadd.s32 4, %s1598_s29  ;;  %v2101_v29 = vld [vmem:[#allocation6 + $0x60] sm:$0xff]  ;;  %v2114_v37 = vld [vmem:[#allocation6 + $0x58] sm:$0xff]  ;;  %v2133_v49 = vld [vmem:[#allocation6 + $0x50] sm:$0xff]  ;;  %vm348_vm1 = vcmp.eq.s32.totalorder %v2050_v4, %v2069_v13 }
  0x23   : > { %s2044_s15 = sld [smem:[#allocation2 + %s763_s14]]  ;;  %v2103_v30 = vld [vmem:[#allocation6 + $0xe0] sm:$0xff]  ;;  %v2123_v42 = vld [vmem:[#allocation6 + $0xd8] sm:$0xff]  ;;  %2959 = vst [vmem:[#allocation19_spill] sm:$0xff] %v2133_v49  ;;  %v2143_v58 = vld [vmem:[#allocation6 + $0xd0] sm:$0xff]  ;;  %s500_s17 = sadd.s32 2, %s2039_s28  ;;  %vm349_vm0 = vcmp.eq.s32.totalorder %v2067_v12, %v2069_v13 }
  0x24   : > { %v2110_v35 = vld [vmem:[#allocation6 + $0x160] sm:$0xff]  ;;  %v2129_v47 = vld [vmem:[#allocation6 + $0x158] sm:$0xff]  ;;  %2960 = vst [vmem:[#allocation20_spill] sm:$0xff] %v2143_v58  ;;  %v2145_v59 = vld [vmem:[#allocation6 + $0x150] sm:$0xff]  ;;  %s2289_s18 = sld [smem:[#allocation2 + %s2039_s28]]  ;;  %s552_s19 = sadd.s32 3, %s2039_s28 }
  0x25   : > { %v2060_v9 = vstv %s640_s30  ;;  %v2112_v36 = vld [vmem:[#allocation6 + $0x1e0] sm:$0xff]  ;;  %v2131_v48 = vld [vmem:[#allocation6 + $0x1d8] sm:$0xff]  ;;  %2961 = vst [vmem:[#allocation21_spill] sm:$0xff] %v2145_v59  ;;  %v2147_v60 = vld [vmem:[#allocation6 + $0x1d0] sm:$0xff]  ;;  %s2298_s20 = sld [smem:[#allocation2 + %s448_s16]]  ;;  %s604_s21 = sadd.s32 4, %s2039_s28 }
  0x26   : > { %v657_v15 = vmul.f32 %v2060_v9, %v2042_v1  ;;  %v2075_v16 = vstv %s659_s9  ;;  %v656_v17 = vmul.f32 %v2060_v9, %v2046_v2  ;;  %v655_v18 = vmul.f32 %v2060_v9, %v2048_v3  ;;  %2962 = vst [vmem:[#allocation22_spill] sm:$0xff] %v2147_v60  ;;  %s2308_s22 = sld [smem:[#allocation2 + %s500_s17]]  ;;  %s2538_s27 = sadd.s32 512, %s2039_s28 }
  0x27   : > { %v676_v19 = vmul.f32 %v2075_v16, %v2052_v5  ;;  %v2083_v20 = vstv %s694_s11  ;;  %v675_v22 = vmul.f32 %v2075_v16, %v2054_v6  ;;  %v674_v24 = vmul.f32 %v2075_v16, %v2056_v7  ;;  %s2318_s23 = sld [smem:[#allocation2 + %s552_s19]]  ;;  %s979_s29 = sadd.s32 1, %s2538_s27 }
  0x28   : > { %v711_v25 = vmul.f32 %v2083_v20, %v2058_v8  ;;  %v2095_v26 = vstv %s729_s13  ;;  %v710_v27 = vmul.f32 %v2083_v20, %v2062_v10  ;;  %v709_v28 = vmul.f32 %v2083_v20, %v2064_v11  ;;  %s2322_s26 = sld [smem:[#allocation2 + %s604_s21]]  ;;  %s1014_s30 = sadd.s32 2, %s2538_s27 }
  0x29   : > { %v692_v31 = vadd.f32 %v676_v19, %v657_v15  ;;  %v746_v32 = vmul.f32 %v2095_v26, %v2071_v14  ;;  %v2108_v33 = vstv %s2044_s15  ;;  %v691_v34 = vadd.f32 %v675_v22, %v656_v17  ;;  %v2155_v15 = vld [vmem:[#allocation6 + $0x48] sm:$0xff]  ;;  %v2267_v14 = vld [vmem:[#allocation6 + $0x198] sm:$0xff]  ;;  %s961_s8 = sld [smem:[#allocation2 + %s2538_s27]]  ;;  %s1049_s9 = sadd.s32 3, %s2538_s27 }
  0x2a   : > { %v2117_v38 = vmul.f32 0.0, %v2108_v33  ;;  %v745_v39 = vmul.f32 %v2095_v26, %v2085_v21  ;;  %v690_v40 = vadd.f32 %v674_v24, %v655_v18  ;;  %v744_v41 = vmul.f32 %v2095_v26, %v2089_v23  ;;  %2963 = vst [vmem:[#allocation23_spill] sm:$0xff] %v2155_v15  ;;  %v2157_v17 = vld [vmem:[#allocation6 + $0xc8] sm:$0xff]  ;;  %s980_s10 = sld [smem:[#allocation2 + %s979_s29]]  ;;  %s1084_s28 = sadd.s32 4, %s2538_s27 }
  0x2b   : > { %v727_v43 = vadd.f32 %v711_v25, %v692_v31  ;;  %v726_v44 = vadd.f32 %v710_v27, %v691_v34  ;;  %v654_v45 = vmul.f32 %v2060_v9, %v2101_v29  ;;  %v673_v46 = vmul.f32 %v2075_v16, %v2103_v30  ;;  %2964 = vst [vmem:[#allocation24_spill] sm:$0xff] %v2157_v17  ;;  %v2161_v25 = vld [vmem:[#allocation6 + $0x148] sm:$0xff]  ;;  %s1015_s11 = sld [smem:[#allocation2 + %s1014_s30]] }
  0x2c   : > { %v725_v50 = vadd.f32 %v709_v28, %v690_v40  ;;  %v708_v51 = vmul.f32 %v2083_v20, %v2110_v35  ;;  %v743_v52 = vmul.f32 %v2095_v26, %v2112_v36  ;;  %v653_v53 = vmul.f32 %v2060_v9, %v2114_v37  ;;  %2965 = vst [vmem:[#allocation25_spill] sm:$0xff] %v2161_v25  ;;  %v2163_v27 = vld [vmem:[#allocation6 + $0x1c8] sm:$0xff]  ;;  %v2165_v28 = vld [vmem:[#allocation6 + $0x40] sm:$0xff]  ;;  %s1050_s12 = sld [smem:[#allocation2 + %s1049_s9]] }
  0x2d   : > { %v762_v54 = vadd.f32 %v746_v32, %v727_v43  ;;  %v761_v55 = vadd.f32 %v745_v39, %v726_v44  ;;  %v689_v56 = vadd.f32 %v673_v46, %v654_v45  ;;  %v672_v57 = vmul.f32 %v2075_v16, %v2123_v42  ;;  %2966 = vst [vmem:[#allocation26_spill] sm:$0xff] %v2163_v27  ;;  %v2174_v40 = vld [vmem:[#allocation6 + $0xc0] sm:$0xff]  ;;  %s1085_s13 = sld [smem:[#allocation2 + %s1084_s28]] }
  0x2e   : > { %v760_v61 = vadd.f32 %v744_v41, %v725_v50  ;;  %v707_v62 = vmul.f32 %v2083_v20, %v2129_v47  ;;  %v742_v63 = vmul.f32 %v2095_v26, %v2131_v48  ;;  %v652_v0 = vmul.f32 %v2060_v9, %v2133_v49  ;;  %2967 = vst [vmem:[#allocation27_spill] sm:$0xff] %v2165_v28  ;;  %v2180_v46 = vld [vmem:[#allocation6 + $0x140] sm:$0xff]  ;;  %v2218_v49 = vld [vmem:[#allocation6 + $0x28] sm:$0xff] }
  0x2f   : > { %v797_v18 = vadd.f32 %v2117_v38, %v762_v54  ;;  %v796_v19 = vadd.f32 %v2117_v38, %v761_v55  ;;  %v724_v22 = vadd.f32 %v708_v51, %v689_v56  ;;  %v688_v24 = vadd.f32 %v672_v57, %v653_v53  ;;  %2968 = vst [vmem:[#allocation28_spill] sm:$0xff] %v2174_v40  ;;  %v2182_v50 = vld [vmem:[#allocation6 + $0x1c0] sm:$0xff]  ;;  %v2184_v51 = vld [vmem:[#allocation6 + $0x38] sm:$0xff] }
  0x30   : > { %v795_v31 = vadd.f32 %v2117_v38, %v760_v61  ;;  %v671_v32 = vmul.f32 %v2075_v16, %v2143_v58  ;;  %v706_v34 = vmul.f32 %v2083_v20, %v2145_v59  ;;  %v741_v39 = vmul.f32 %v2095_v26, %v2147_v60  ;;  %2969 = vst [vmem:[#allocation29_spill] sm:$0xff] %v2180_v46  ;;  %v2192_v56 = vld [vmem:[#allocation6 + $0xb8] sm:$0xff]  ;;  %v2216_v58 = vld [vmem:[#allocation6 + $0x1b0] sm:$0xff] }
  0x31   : > { %798 = vmatpush.msra.mxu0 %v797_v18  ;;  %v759_v41 = vadd.f32 %v743_v52, %v724_v22  ;;  %v723_v43 = vadd.f32 %v707_v62, %v688_v24  ;;  %v651_v44 = vmul.f32 %v2060_v9, %v2155_v15  ;;  %v670_v45 = vmul.f32 %v2075_v16, %v2157_v17  ;;  %v2197_v22 = vld [vmem:[#allocation6 + $0x138] sm:$0xff]  ;;  %v2246_v17 = vld [vmem:[#allocation6 + $0x120] sm:$0xff] }
  0x32   : > { %2970 = vst [vmem:[#allocation30_spill] sm:$0xff] %v2182_v50  ;;  %v687_v53 = vadd.f32 %v671_v32, %v652_v0  ;;  %v705_v54 = vmul.f32 %v2083_v20, %v2161_v25  ;;  %v740_v52 = vmul.f32 %v2095_v26, %v2163_v27  ;;  %v650_v55 = vmul.f32 %v2060_v9, %v2165_v28  ;;  %v2199_v24 = vld [vmem:[#allocation6 + $0x1b8] sm:$0xff]  ;;  %v2201_v32 = vld [vmem:[#allocation6 + $0x30] sm:$0xff] }
  0x33   : > { %2971 = vst [vmem:[#allocation31_spill] sm:$0xff] %v2184_v51  ;;  %1601 = vmatpush.msra.mxu3 %v797_v18  ;;  %799 = vmatpush.msra.mxu0 %v796_v19  ;;  %v794_v57 = vadd.f32 %v2117_v38, %v759_v41  ;;  %v758_v61 = vadd.f32 %v742_v63, %v723_v43  ;;  %v2209_v41 = vld [vmem:[#allocation6 + $0xb0] sm:$0xff] }
  0x34   : > { %2972 = vst [vmem:[#allocation32_spill] sm:$0xff] %v2192_v56  ;;  %v686_v62 = vadd.f32 %v670_v45, %v651_v44  ;;  %v669_v0 = vmul.f32 %v2075_v16, %v2174_v40  ;;  %v722_v60 = vadd.f32 %v706_v34, %v687_v53  ;;  %v704_v59 = vmul.f32 %v2083_v20, %v2180_v46  ;;  %v2214_v53 = vld [vmem:[#allocation6 + $0x130] sm:$0xff] }
  0x35   : > { %2973 = vst [vmem:[#allocation33_spill] sm:$0xff] %v2197_v22  ;;  %v739_v18 = vmul.f32 %v2095_v26, %v2182_v50  ;;  %v649_v63 = vmul.f32 %v2060_v9, %v2184_v51  ;;  %1602 = vmatpush.msra.mxu3 %v796_v19  ;;  %800 = vmatpush.msra.mxu0 %v795_v31  ;;  %v2286_v50 = vld [vmem:[#allocation6 + $0x190] sm:$0xff] }
  0x36   : > { %2974 = vst [vmem:[#allocation34_spill] sm:$0xff] %v2199_v24  ;;  %v793_v43 = vadd.f32 %v2117_v38, %v758_v61  ;;  %v721_v44 = vadd.f32 %v705_v54, %v686_v62  ;;  %v685_v45 = vadd.f32 %v669_v0, %v650_v55  ;;  %v668_v34 = vmul.f32 %v2075_v16, %v2192_v56  ;;  %v2226_v55 = vld [vmem:[#allocation6 + $0xa8] sm:$0xff] }
  0x37   : > { %2975 = vst [vmem:[#allocation35_spill] sm:$0xff] %v2201_v32  ;;  %v757_v27 = vadd.f32 %v741_v39, %v722_v60  ;;  %v703_v51 = vmul.f32 %v2083_v20, %v2197_v22  ;;  %v738_v19 = vmul.f32 %v2095_v26, %v2199_v24  ;;  %v648_v54 = vmul.f32 %v2060_v9, %v2201_v32  ;;  %v2230_v60 = vld [vmem:[#allocation6 + $0x128] sm:$0xff]  ;;  %v2234_v22 = vld [vmem:[#allocation6 + $0x20] sm:$0xff] }
  0x38   : > { %2976 = vst [vmem:[#allocation36_spill] sm:$0xff] %v2209_v41  ;;  %1603 = vmatpush.msra.mxu3 %v795_v31  ;;  %801 = vmatpush.msra.mxu0 %v794_v57  ;;  %v756_v61 = vadd.f32 %v740_v52, %v721_v44  ;;  %v720_v62 = vadd.f32 %v704_v59, %v685_v45  ;;  %v2232_v39 = vld [vmem:[#allocation6 + $0x1a8] sm:$0xff]  ;;  %v2243_v52 = vld [vmem:[#allocation6 + $0xa0] sm:$0xff] }
  0x39   : > { %2977 = vst [vmem:[#allocation37_spill] sm:$0xff] %v2214_v53  ;;  %v684_v0 = vadd.f32 %v668_v34, %v649_v63  ;;  %v667_v56 = vmul.f32 %v2075_v16, %v2209_v41  ;;  %v792_v24 = vadd.f32 %v2117_v38, %v757_v27  ;;  %v702_v25 = vmul.f32 %v2083_v20, %v2214_v53  ;;  %v2248_v27 = vld [vmem:[#allocation6 + $0x1a0] sm:$0xff]  ;;  %v2250_v53 = vld [vmem:[#allocation6 + $0x18] sm:$0xff] }
  0x3a   : > { %2978 = vst [vmem:[#allocation38_spill] sm:$0xff] %v2216_v58  ;;  %v737_v31 = vmul.f32 %v2095_v26, %v2216_v58  ;;  %v647_v59 = vmul.f32 %v2060_v9, %v2218_v49  ;;  %1604 = vmatpush.msra.mxu3 %v794_v57  ;;  %802 = vmatpush.msra.mxu0 %v793_v43 }
  0x3b   : > { %2979 = vst [vmem:[#allocation39_spill] sm:$0xff] %v2230_v60  ;;  %v791_v63 = vadd.f32 %v2117_v38, %v756_v61  ;;  %v755_v44 = vadd.f32 %v739_v18, %v720_v62  ;;  %v719_v45 = vadd.f32 %v703_v51, %v684_v0  ;;  %v683_v34 = vadd.f32 %v667_v56, %v648_v54  ;;  %v2260_v56 = vld [vmem:[#allocation6 + $0x98] sm:$0xff] }
  0x3c   : > { %2980 = vst [vmem:[#allocation40_spill] sm:$0xff] %v2232_v39  ;;  %v666_v58 = vmul.f32 %v2075_v16, %v2226_v55  ;;  %v701_v15 = vmul.f32 %v2083_v20, %v2230_v60  ;;  %v736_v57 = vmul.f32 %v2095_v26, %v2232_v39  ;;  %v646_v51 = vmul.f32 %v2060_v9, %v2234_v22  ;;  %v2265_v0 = vld [vmem:[#allocation6 + $0x118] sm:$0xff]  ;;  %v2269_v39 = vld [vmem:[#allocation6 + $0x10] sm:$0xff] }
  0x3d   : > { %2981 = vst [vmem:[#allocation41_spill] sm:$0xff] %v2234_v22  ;;  %1605 = vmatpush.msra.mxu3 %v793_v43  ;;  %803 = vmatpush.msra.mxu0 %v792_v24  ;;  %v790_v18 = vadd.f32 %v2117_v38, %v755_v44  ;;  %v754_v54 = vadd.f32 %v738_v19, %v719_v45  ;;  %v2278_v44 = vld [vmem:[#allocation6 + $0x90] sm:$0xff] }
  0x3e   : > { %2982 = vst [vmem:[#allocation42_spill] sm:$0xff] %v2243_v52  ;;  %v718_v61 = vadd.f32 %v702_v25, %v683_v34  ;;  %v665_v62 = vmul.f32 %v2075_v16, %v2243_v52  ;;  %v682_v41 = vadd.f32 %v666_v58, %v647_v59  ;;  %v700_v43 = vmul.f32 %v2083_v20, %v2246_v17  ;;  %v2284_v59 = vld [vmem:[#allocation6 + $0x110] sm:$0xff] }
  0x3f   : > { %2983 = vst [vmem:[#allocation43_spill] sm:$0xff] %v2246_v17  ;;  %v735_v19 = vmul.f32 %v2095_v26, %v2248_v27  ;;  %v645_v25 = vmul.f32 %v2060_v9, %v2250_v53  ;;  %1606 = vmatpush.msra.mxu3 %v792_v24  ;;  %804 = vmatpush.msra.mxu0 %v791_v63 }
  0x40   : > { %2984 = vst [vmem:[#allocation44_spill] sm:$0xff] %v2248_v27  ;;  %v789_v45 = vadd.f32 %v2117_v38, %v754_v54  ;;  %v753_v34 = vadd.f32 %v737_v31, %v718_v61  ;;  %v681_v32 = vadd.f32 %v665_v62, %v646_v51  ;;  %v664_v58 = vmul.f32 %v2075_v16, %v2260_v56  ;;  %v2306_v62 = vld [vmem:[#allocation6 + $0x88] sm:$0xff] }
  0x41   : > { %2985 = vst [vmem:[#allocation45_spill] sm:$0xff] %v2250_v53  ;;  %v717_v46 = vadd.f32 %v701_v15, %v682_v41  ;;  %v699_v24 = vmul.f32 %v2083_v20, %v2265_v0  ;;  %v734_v8 = vmul.f32 %v2095_v26, %v2267_v14  ;;  %v644_v31 = vmul.f32 %v2060_v9, %v2269_v39  ;;  %v2304_v41 = vld [vmem:[#allocation6 + $0x8] sm:$0xff] }
  0x42   : > { %2986 = vst [vmem:[#allocation46_spill] sm:$0xff] %v2260_v56  ;;  %1607 = vmatpush.msra.mxu3 %v791_v63  ;;  %805 = vmatpush.msra.mxu0 %v790_v18  ;;  %v788_v51 = vadd.f32 %v2117_v38, %v753_v34  ;;  %v716_v54 = vadd.f32 %v700_v43, %v681_v32  ;;  %v2316_v32 = vld [vmem:[#allocation6 + $0x108] sm:$0xff] }
  0x43   : > { %2987 = vst [vmem:[#allocation47_spill] sm:$0xff] %v2265_v0  ;;  %v680_v61 = vadd.f32 %v664_v58, %v645_v25  ;;  %v663_v15 = vmul.f32 %v2075_v16, %v2278_v44  ;;  %v752_v40 = vadd.f32 %v736_v57, %v717_v46  ;;  %v698_v63 = vmul.f32 %v2083_v20, %v2284_v59  ;;  %v2320_v58 = vld [vmem:[#allocation6 + $0x188] sm:$0xff] }
  0x44   : > { %2988 = vst [vmem:[#allocation48_spill] sm:$0xff] %v2267_v14  ;;  %v733_v28 = vmul.f32 %v2095_v26, %v2286_v50  ;;  %1608 = vmatpush.msra.mxu3 %v790_v18  ;;  %806 = vmatpush.msra.mxu0 %v789_v45  ;;  %v751_v43 = vadd.f32 %v735_v19, %v716_v54  ;;  %v1933_v57 = vmov 0.0   ;;  %v2331_v18 = vld [vmem:[#allocation6] sm:$0xff] }
  0x45   : > { %2989 = vst [vmem:[#allocation49_spill] sm:$0xff] %v2269_v39  ;;  %v715_v25 = vadd.f32 %v699_v24, %v680_v61  ;;  %v679_v34 = vadd.f32 %v663_v15, %v644_v31  ;;  %v787_v46 = vadd.f32 %v2117_v38, %v752_v40  ;;  %v2325_v60 = vsel %vm349_vm0, 1.0, %v1933_v57  ;;  %v2336_v54 = vld [vmem:[#allocation6 + $0x80] sm:$0xff] }
  0x46   : > { %2990 = vst [vmem:[#allocation50_spill] sm:$0xff] %v2278_v44  ;;  %v643_v12 = vmul.f32 %v2060_v9, %v2304_v41  ;;  %v662_v27 = vmul.f32 %v2075_v16, %v2306_v62  ;;  %1609 = vmatpush.msra.mxu3 %v789_v45  ;;  %807 = vmatpush.msra.mxu0 %v788_v51  ;;  %v2338_v61 = vld [vmem:[#allocation6 + $0x100] sm:$0xff] }
  0x47   : > { %2991 = vst [vmem:[#allocation51_spill] sm:$0xff] %v2284_v59  ;;  %v786_v19 = vadd.f32 %v2117_v38, %v751_v43  ;;  %v750_v24 = vadd.f32 %v734_v8, %v715_v25  ;;  %v714_v31 = vadd.f32 %v698_v63, %v679_v34  ;;  %v697_v40 = vmul.f32 %v2083_v20, %v2316_v32  ;;  %v2340_v15 = vld [vmem:[#allocation6 + $0x180] sm:$0xff] }
  0x48   : > { %2992 = vst [vmem:[#allocation52_spill] sm:$0xff] %v2286_v50  ;;  %v678_v5 = vadd.f32 %v662_v27, %v643_v12  ;;  %v732_v1 = vmul.f32 %v2095_v26, %v2320_v58  ;;  %v767_v45 = vmul.f32 %v2108_v33, %v2325_v60  ;;  %1610 = vmatpush.msra.mxu3 %v788_v51  ;;  %v396_v43 = vsel %vm348_vm1, 1.0, %v1933_v57 }
  0x49   : > { %2993 = vst [vmem:[#allocation53_spill] sm:$0xff] %v2304_v41  ;;  %808 = vmatpush.msra.mxu0 %v787_v46  ;;  %v785_v8 = vadd.f32 %v2117_v38, %v750_v24  ;;  %v749_v63 = vadd.f32 %v733_v28, %v714_v31  ;;  %v642_v27 = vmul.f32 %v2060_v9, %v2331_v18  ;;  %v2360_v9 = vstv %s2289_s18 }
  0x4a   : > { %2994 = vst [vmem:[#allocation54_spill] sm:$0xff] %v2306_v62  ;;  %v713_v25 = vadd.f32 %v697_v40, %v678_v5  ;;  %v661_v34 = vmul.f32 %v2075_v16, %v2336_v54  ;;  %v696_v12 = vmul.f32 %v2083_v20, %v2338_v61  ;;  %v731_v4 = vmul.f32 %v2095_v26, %v2340_v15 }
  0x4b   : > { %2995 = vst [vmem:[#allocation55_spill] sm:$0xff] %v2316_v32  ;;  %1611 = vmatpush.msra.mxu3 %v787_v46  ;;  %809 = vmatpush.msra.mxu0 %v786_v19  ;;  %v784_v13 = vadd.f32 %v2117_v38, %v749_v63  ;;  %v766_v28 = vmul.f32 %v2108_v33, %v396_v43  ;;  %v2363_v5 = vstv %s2298_s20  ;;  %v2370_v26 = vstv %s2308_s22  ;;  %s325_s22 = scalar_select %p324_p7, %s1986_s25, 1 }
  0x4c   : > { %2996 = vst [vmem:[#allocation56_spill] sm:$0xff] %v2320_v58  ;;  %v748_v51 = vadd.f32 %v732_v1, %v713_v25  ;;  %v677_v16 = vadd.f32 %v661_v34, %v642_v27  ;;  %v432_v57 = vmul.f32 %v2360_v9, %v2331_v18  ;;  %v468_v20 = vmul.f32 %v2363_v5, %v2336_v54 }
  0x4d   : > { %2997 = vst [vmem:[#allocation57_spill] sm:$0xff] %v2331_v18  ;;  %1612 = vmatpush.msra.mxu3 %v786_v19  ;;  %810 = vmatpush.msra.mxu0 %v785_v8  ;;  %v2373_v46 = vstv %s2318_s23  ;;  %v606_v38 = vstv %s2322_s26  ;;  %v433_v33 = vmul.f32 %v2360_v9, %v2304_v41  ;;  %v520_v40 = vmul.f32 %v2370_v26, %v2338_v61  ;;  %v3008_v18 = vld [vmem:[#allocation29_spill] sm:$0xff]  ;;  %s1596_s23 = sshll.u32 %s325_s22, 5 }
  0x4e   : > { %2998 = vst [vmem:[#allocation58_spill] sm:$0xff] %v2336_v54  ;;  %v783_v24 = vadd.f32 %v767_v45, %v748_v51  ;;  %v712_v31 = vadd.f32 %v696_v12, %v677_v16  ;;  %v484_v1 = vadd.f32 %v468_v20, %v432_v57  ;;  %v572_v19 = vmul.f32 %v2373_v46, %v2340_v15  ;;  %s328_s29 = scalar_lea.vmem %s2876_s5, %s1596_s23 }
  0x4f   : > { %2999 = vst [vmem:[#allocation59_spill] sm:$0xff] %v2338_v61  ;;  %1613 = vmatpush.msra.mxu3 %v785_v8  ;;  %811 = vmatpush.msra.mxu0 %v784_v13  ;;  %v469_v63 = vmul.f32 %v2363_v5, %v2306_v62  ;;  %v607_v34 = vmul.f32 %v606_v38, %v396_v43  ;;  %v3009_v62 = vld [vmem:[#allocation30_spill] sm:$0xff] }
  0x50   : > { %3000 = vst [vmem:[#allocation60_spill] sm:$0xff] %v2340_v15  ;;  %v747_v27 = vadd.f32 %v731_v4, %v712_v31  ;;  %v536_v25 = vadd.f32 %v520_v40, %v484_v1  ;;  %v521_v54 = vmul.f32 %v2370_v26, %v2316_v32  ;;  %v573_v12 = vmul.f32 %v2373_v46, %v2320_v58  ;;  %v3007_v58 = vld [vmem:[#allocation17_spill] sm:$0xff] }
  0x51   : > { %1614 = vmatpush.msra.mxu3 %v784_v13  ;;  %812 = vmatpush.msra.mxu0 %v783_v24  ;;  %v485_v45 = vadd.f32 %v469_v63, %v433_v33  ;;  %v434_v16 = vmul.f32 %v2360_v9, %v2269_v39  ;;  %v470_v4 = vmul.f32 %v2363_v5, %v2278_v44 }
  0x52   : > { %v782_v8 = vadd.f32 %v766_v28, %v747_v27  ;;  %v588_v51 = vadd.f32 %v572_v19, %v536_v25  ;;  %v443_v43 = vmul.f32 %v2360_v9, %v2114_v37  ;;  %v479_v13 = vmul.f32 %v2363_v5, %v2123_v42 }
  0x53   : > { %1615 = vmatpush.msra.mxu3 %v783_v24  ;;  %v537_v57 = vadd.f32 %v521_v54, %v485_v45  ;;  %v531_v28 = vmul.f32 %v2370_v26, %v2129_v47  ;;  %v608_v33 = vmul.f32 %v606_v38, %v2325_v60  ;;  %v583_v31 = vmul.f32 %v2373_v46, %v2131_v48 }
  0x54   : > { %813 = vmatpush.msra.mxu0 %v782_v8  ;;  %v623_v20 = vadd.f32 %v607_v34, %v588_v51  ;;  %v495_v24 = vadd.f32 %v479_v13, %v443_v43  ;;  %v486_v1 = vadd.f32 %v470_v4, %v434_v16  ;;  %v522_v40 = vmul.f32 %v2370_v26, %v2284_v59 }
  0x55   : > { %1616 = vmatpush.msra.mxu3 %v782_v8  ;;  %v589_v54 = vadd.f32 %v573_v12, %v537_v57  ;;  %v444_v19 = vmul.f32 %v2360_v9, %v2101_v29  ;;  %v480_v27 = vmul.f32 %v2363_v5, %v2103_v30  ;;  %v2407_v25 = vmul.f32 0.0, %v606_v38 }
  0x56   : > { %814 = vmatmul.f32.vlgmr.msra.gmra.mxu0 %v623_v20  ;;  %v547_v63 = vadd.f32 %v531_v28, %v495_v24  ;;  %v532_v60 = vmul.f32 %v2370_v26, %v2110_v35  ;;  %v574_v34 = vmul.f32 %v2373_v46, %v2286_v50  ;;  %v584_v8 = vmul.f32 %v2373_v46, %v2112_v36  ;;  %v3010_v50 = vld [vmem:[#allocation35_spill] sm:$0xff] }
  0x57   : > { %v496_v12 = vadd.f32 %v480_v27, %v444_v19  ;;  %v624_v51 = vadd.f32 %v608_v33, %v589_v54  ;;  %v538_v16 = vadd.f32 %v522_v40, %v486_v1  ;;  %v435_v4 = vmul.f32 %v2360_v9, %v2250_v53 }
  0x58   : > { %v599_v45 = vadd.f32 %v583_v31, %v547_v63  ;;  %v471_v38 = vmul.f32 %v2363_v5, %v2260_v56  ;;  %v445_v13 = vmul.f32 %v2360_v9, %v2048_v3  ;;  %v481_v28 = vmul.f32 %v2363_v5, %v2056_v7 }
  0x59   : > { %v548_v43 = vadd.f32 %v532_v60, %v496_v12  ;;  %v590_v33 = vadd.f32 %v574_v34, %v538_v16  ;;  %v523_v31 = vmul.f32 %v2370_v26, %v2265_v0  ;;  %v533_v54 = vmul.f32 %v2370_v26, %v2064_v11  ;;  %v3016_v0 = vld [vmem:[#allocation37_spill] sm:$0xff] }
  0x5a   : > { %v634_v57 = vadd.f32 %v2407_v25, %v599_v45  ;;  %v487_v24 = vadd.f32 %v471_v38, %v435_v4  ;;  %v497_v1 = vadd.f32 %v481_v28, %v445_v13  ;;  %v575_v40 = vmul.f32 %v2373_v46, %v2267_v14 }
  0x5b   : > { %v600_v20 = vadd.f32 %v584_v8, %v548_v43  ;;  %v585_v19 = vmul.f32 %v2373_v46, %v2089_v23  ;;  %v446_v60 = vmul.f32 %v2360_v9, %v2046_v2  ;;  %v482_v34 = vmul.f32 %v2363_v5, %v2054_v6 }
  0x5c   : > { %847 = vmatmul.f32.vlgmr.msra.gmra.mxu3 %v634_v57  ;;  %v549_v27 = vadd.f32 %v533_v54, %v497_v1  ;;  %v625_v45 = vadd.f32 %v2407_v25, %v590_v33  ;;  %v539_v12 = vadd.f32 %v523_v31, %v487_v24  ;;  %v436_v8 = vmul.f32 %v2360_v9, %v2234_v22  ;;  %v3001_v54 = vld [vmem:[#allocation15_spill] sm:$0xff] }
  0x5d   : > { %v635_v63 = vadd.f32 %v2407_v25, %v600_v20  ;;  %v498_v4 = vadd.f32 %v482_v34, %v446_v60  ;;  %v534_v38 = vmul.f32 %v2370_v26, %v2062_v10  ;;  %v524_v13 = vmul.f32 %v2370_v26, %v2246_v17  ;;  %v3003_v60 = vld [vmem:[#allocation44_spill] sm:$0xff] }
  0x5e   : > { %817 = vmatmul.f32.gmra.mxu0 %v624_v51  ;;  %v472_v51 = vmul.f32 %v2363_v5, %v2243_v52  ;;  %v601_v16 = vadd.f32 %v585_v19, %v549_v27  ;;  %v591_v57 = vadd.f32 %v575_v40, %v539_v12  ;;  %v437_v20 = vmul.f32 %v2360_v9, %v2218_v49  ;;  %v3002_v40 = vld [vmem:[#allocation16_spill] sm:$0xff] }
  0x5f   : > { %v473_v28 = vmul.f32 %v2363_v5, %v2226_v55  ;;  %v586_v33 = vmul.f32 %v2373_v46, %v2085_v21  ;;  %v550_v31 = vadd.f32 %v534_v38, %v498_v4  ;;  %v447_v1 = vmul.f32 %v2360_v9, %v3001_v54  ;;  %v3021_v52 = vld [vmem:[#allocation32_spill] sm:$0xff] }
  0x60   : > { %v488_v43 = vadd.f32 %v472_v51, %v436_v8  ;;  %v636_v24 = vadd.f32 %v2407_v25, %v601_v16  ;;  %v483_v19 = vmul.f32 %v2363_v5, %v3002_v40  ;;  %v576_v34 = vmul.f32 %v2373_v46, %v3003_v60  ;;  %v3005_v8 = vld [vmem:[#allocation27_spill] sm:$0xff]  ;;  %v3006_v16 = vld [vmem:[#allocation28_spill] sm:$0xff]  ;;  %v3018_v60 = vld [vmem:[#allocation26_spill] sm:$0xff] }
  0x61   : > { %v440_v51 = vmul.f32 %v2360_v9, %v3005_v8  ;;  %v476_v4 = vmul.f32 %v2363_v5, %v3006_v16  ;;  %v489_v38 = vadd.f32 %v473_v28, %v437_v20  ;;  %v602_v15 = vadd.f32 %v586_v33, %v550_v31  ;;  %v3011_v20 = vld [vmem:[#allocation36_spill] sm:$0xff]  ;;  %v3012_v31 = vld [vmem:[#allocation18_spill] sm:$0xff] }
  0x62   : > { %v540_v27 = vadd.f32 %v524_v13, %v488_v43  ;;  %v499_v61 = vadd.f32 %v483_v19, %v447_v1  ;;  %v528_v32 = vmul.f32 %v2370_v26, %v3008_v18  ;;  %v580_v41 = vmul.f32 %v2373_v46, %v3009_v62 }
  0x63   : > { %v492_v13 = vadd.f32 %v476_v4, %v440_v51  ;;  %v438_v59 = vmul.f32 %v2360_v9, %v3010_v50  ;;  %v474_v28 = vmul.f32 %v2363_v5, %v3011_v20  ;;  %v637_v33 = vadd.f32 %v2407_v25, %v602_v15  ;;  %v3014_v4 = vld [vmem:[#allocation23_spill] sm:$0xff] }
  0x64   : > { %850 = vmatmul.f32.gmra.mxu3 %v635_v63  ;;  %v626_v63 = vadd.f32 %v2407_v25, %v591_v57  ;;  %v535_v57 = vmul.f32 %v2370_v26, %v3007_v58  ;;  %v592_v43 = vadd.f32 %v576_v34, %v540_v27  ;;  %v587_v1 = vmul.f32 %v2373_v46, %v3012_v31  ;;  %v3013_v27 = vld [vmem:[#allocation40_spill] sm:$0xff] }
  0x65   : > { %v544_v14 = vadd.f32 %v528_v32, %v492_v13  ;;  %v577_v34 = vmul.f32 %v2373_v46, %v3013_v27  ;;  %v441_v44 = vmul.f32 %v2360_v9, %v3014_v4  ;;  %v3015_v32 = vld [vmem:[#allocation24_spill] sm:$0xff]  ;;  %v490_v39 = vadd.f32 %v474_v28, %v438_v59  ;;  %v3020_v59 = vld [vmem:[#allocation31_spill] sm:$0xff] }
  0x66   : > { %820 = vmatmul.f32.gmra.mxu0 %v625_v45  ;;  %v3004_v45 = vld [vmem:[#allocation39_spill] sm:$0xff]  ;;  %v627_v19 = vadd.f32 %v2407_v25, %v592_v43  ;;  %v477_v13 = vmul.f32 %v2363_v5, %v3015_v32  ;;  %v439_v28 = vmul.f32 %v2360_v9, %v3020_v59 }
  0x67   : > { %v525_v12 = vmul.f32 %v2370_v26, %v3004_v45  ;;  %v596_v51 = vadd.f32 %v580_v41, %v544_v14  ;;  %v581_v14 = vmul.f32 %v2373_v46, %v3018_v60  ;;  %v3019_v41 = vld [vmem:[#allocation38_spill] sm:$0xff] }
  0x68   : > { %v493_v43 = vadd.f32 %v477_v13, %v441_v44  ;;  %v578_v56 = vmul.f32 %v2373_v46, %v3019_v41  ;;  %v3023_v13 = vld [vmem:[#allocation20_spill] sm:$0xff]  ;;  %v3027_v45 = vld [vmem:[#allocation34_spill] sm:$0xff] }
  0x6c   : > { %853 = vmatmul.f32.gmra.mxu3 %v636_v24  ;;  %v551_v24 = vadd.f32 %v535_v57, %v499_v61  ;;  %v526_v61 = vmul.f32 %v2370_v26, %v3016_v0 }
  0x6e   : > { %823 = vmatmul.f32.gmra.mxu0 %v626_v63  ;;  %v541_v63 = vadd.f32 %v525_v12, %v489_v38  ;;  %v603_v15 = vadd.f32 %v587_v1, %v551_v24  ;;  %v3017_v12 = vld [vmem:[#allocation25_spill] sm:$0xff]  ;;  %v542_v17 = vadd.f32 %v526_v61, %v490_v39 }
  0x6f   : > { %v529_v38 = vmul.f32 %v2370_v26, %v3017_v12 }
  0x70   : > { %v593_v57 = vadd.f32 %v577_v34, %v541_v63  ;;  %v638_v24 = vadd.f32 %v2407_v25, %v603_v15  ;;  %v3022_v63 = vld [vmem:[#allocation19_spill] sm:$0xff]  ;;  %v594_v39 = vadd.f32 %v578_v56, %v542_v17  ;;  %v3025_v15 = vld [vmem:[#allocation21_spill] sm:$0xff]  ;;  %v579_v17 = vmul.f32 %v2373_v46, %v3027_v45 }
  0x71   : > { %v545_v53 = vadd.f32 %v529_v38, %v493_v43  ;;  %v442_v34 = vmul.f32 %v2360_v9, %v3022_v63  ;;  %v478_v43 = vmul.f32 %v2363_v5, %v3023_v13  ;;  %v3024_v38 = vld [vmem:[#allocation33_spill] sm:$0xff] }
  0x72   : > { %v628_v44 = vadd.f32 %v2407_v25, %v593_v57  ;;  %v527_v22 = vmul.f32 %v2370_v26, %v3024_v38  ;;  %v530_v57 = vmul.f32 %v2370_v26, %v3025_v15  ;;  %v629_v9 = vadd.f32 %v2407_v25, %v594_v39 }
  0x73   : > { %v597_v1 = vadd.f32 %v581_v14, %v545_v53  ;;  %v494_v27 = vadd.f32 %v478_v43, %v442_v34  ;;  %v3026_v53 = vld [vmem:[#allocation22_spill] sm:$0xff]  ;;  %v631_v26 = vadd.f32 %v2407_v25, %v596_v51  ;;  %v2554_v43 = vstv %s961_s8 }
  0x74   : > { %856 = vmatmul.f32.gmra.mxu3 %v637_v33  ;;  %v475_v33 = vmul.f32 %v2363_v5, %v3021_v52  ;;  %v582_v14 = vmul.f32 %v2373_v46, %v3026_v53  ;;  %v2556_v39 = vstv %s980_s10 }
  0x76   : > { %826 = vmatmul.f32.gmra.mxu0 %v627_v19  ;;  %v632_v19 = vadd.f32 %v2407_v25, %v597_v1  ;;  %v491_v61 = vadd.f32 %v475_v33, %v439_v28  ;;  %v546_v1 = vadd.f32 %v530_v57, %v494_v27  ;;  %v2560_v57 = vstv %s1050_s12 }
  0x78   : > { %v543_v41 = vadd.f32 %v527_v22, %v491_v61  ;;  %v598_v56 = vadd.f32 %v582_v14, %v546_v1  ;;  %v2558_v61 = vstv %s1015_s11  ;;  %v978_v14 = vmul.f32 %v2554_v43, %v3001_v54 }
  0x79   : > { %v997_v1 = vmul.f32 %v2556_v39, %v3002_v40  ;;  %v1066_v54 = vmul.f32 %v2560_v57, %v2085_v21  ;;  %v994_v21 = vmul.f32 %v2556_v39, %v2103_v30 }
  0x7a   : > { %v633_v5 = vadd.f32 %v2407_v25, %v598_v56  ;;  %v595_v28 = vadd.f32 %v579_v17, %v543_v41  ;;  %v1067_v17 = vmul.f32 %v2560_v57, %v3012_v31  ;;  %v977_v56 = vmul.f32 %v2554_v43, %v2046_v2 }
  0x7b   : > { %v1013_v40 = vadd.f32 %v997_v1, %v978_v14  ;;  %v995_v31 = vmul.f32 %v2556_v39, %v2056_v7  ;;  %v1030_v2 = vmul.f32 %v2558_v61, %v2064_v11  ;;  %v1064_v7 = vmul.f32 %v2560_v57, %v2112_v36 }
  0x7c   : > { %859 = vmatmul.f32.gmra.mxu3 %v638_v24  ;;  %v630_v33 = vadd.f32 %v2407_v25, %v595_v28  ;;  %v1031_v28 = vmul.f32 %v2558_v61, %v2062_v10  ;;  %v975_v10 = vmul.f32 %v2554_v43, %v2101_v29 }
  0x7e   : > { %829 = vmatmul.f32.gmra.mxu0 %v628_v44  ;;  %v1010_v11 = vadd.f32 %v994_v21, %v975_v10 }
  0x86   : > { %832 = vmatmul.f32.gmra.mxu0 %v629_v9  ;;  %v1032_v9 = vmul.f32 %v2558_v61, %v3007_v58  ;;  %v976_v58 = vmul.f32 %v2554_v43, %v2048_v3  ;;  %v1029_v3 = vmul.f32 %v2558_v61, %v2110_v35  ;;  %v1063_v35 = vmul.f32 %v2560_v57, %v2131_v48 }
  0x88   : > { %v1048_v14 = vadd.f32 %v1032_v9, %v1013_v40  ;;  %v1011_v1 = vadd.f32 %v995_v31, %v976_v58  ;;  %v1028_v9 = vmul.f32 %v2558_v61, %v2129_v47  ;;  %v1027_v47 = vmul.f32 %v2558_v61, %v3025_v15 }
  0x89   : > { %v972_v31 = vmul.f32 %v2554_v43, %v3014_v4  ;;  %v1061_v15 = vmul.f32 %v2560_v57, %v3018_v60  ;;  %v990_v4 = vmul.f32 %v2556_v39, %v3006_v16  ;;  %v989_v16 = vmul.f32 %v2556_v39, %v3021_v52 }
  0x8a   : > { %v1046_v30 = vadd.f32 %v1030_v2, %v1011_v1  ;;  %v971_v2 = vmul.f32 %v2554_v43, %v3005_v8  ;;  %v1060_v8 = vmul.f32 %v2560_v57, %v3009_v62 }
  0x8c   : > { %v1006_v60 = vadd.f32 %v990_v4, %v971_v2  ;;  %v3036_v4 = vld [vmem:[#allocation46_spill] sm:$0xff] }
  0x8e   : > { %835 = vmatmul.f32.gmra.mxu0 %v630_v33 }
  0x96   : > { %838 = vmatmul.f32.gmra.mxu0 %v631_v26 }
  0x9e   : > { %841 = vmatmul.f32.gmra.mxu0 %v632_v19 }
  0xa6   : > { %844 = vmatmul.f32.gmra.mxu0 %v633_v5  ;;  %v996_v5 = vmul.f32 %v2556_v39, %v2054_v6  ;;  %v1065_v6 = vmul.f32 %v2560_v57, %v2089_v23  ;;  %v993_v23 = vmul.f32 %v2556_v39, %v2123_v42  ;;  %v973_v42 = vmul.f32 %v2554_v43, %v3022_v63 }
  0xa7   : > { %v991_v63 = vmul.f32 %v2556_v39, %v3015_v32 }
  0xa8   : > { %v1012_v26 = vadd.f32 %v996_v5, %v977_v56  ;;  %v974_v56 = vmul.f32 %v2554_v43, %v2114_v37  ;;  %v1083_v5 = vadd.f32 %v1067_v17, %v1048_v14  ;;  %v1081_v40 = vadd.f32 %v1065_v6, %v1046_v30 }
  0xa9   : > { %v992_v17 = vmul.f32 %v2556_v39, %v3023_v13  ;;  %v1026_v13 = vmul.f32 %v2558_v61, %v3017_v12  ;;  %v1007_v10 = vadd.f32 %v991_v63, %v972_v31  ;;  %v970_v12 = vmul.f32 %v2554_v43, %v3020_v59  ;;  %v3034_v63 = vld [vmem:[#allocation43_spill] sm:$0xff] }
  0xaa   : > { %v1009_v37 = vadd.f32 %v993_v23, %v974_v56  ;;  %1103 = vmatpush.msra.mxu1 %v1083_v5  ;;  %1617 = vmatpush.msra.mxu2 %v1083_v5  ;;  %v988_v59 = vmul.f32 %v2556_v39, %v3011_v20  ;;  %v987_v20 = vmul.f32 %v2556_v39, %v2226_v55  ;;  %v3029_v5 = vld [vmem:[#allocation39_spill] sm:$0xff] }
  0xab   : > { %v1042_v1 = vadd.f32 %v1026_v13, %v1007_v10  ;;  %v1005_v62 = vadd.f32 %v989_v16, %v970_v12  ;;  %v1022_v30 = vmul.f32 %v2558_v61, %v3029_v5  ;;  %v1021_v13 = vmul.f32 %v2558_v61, %v3034_v63  ;;  %v3039_v16 = vld [vmem:[#allocation49_spill] sm:$0xff]  ;;  %v3045_v5 = vld [vmem:[#allocation54_spill] sm:$0xff]  ;;  %v3051_v63 = vld [vmem:[#allocation60_spill] sm:$0xff] }
  0xac   : > { %v1044_v48 = vadd.f32 %v1028_v9, %v1009_v37  ;;  %v3031_v37 = vld [vmem:[#allocation40_spill] sm:$0xff] }
  0xae   : > { %v1079_v32 = vadd.f32 %v1063_v35, %v1044_v48  ;;  %v3030_v35 = vld [vmem:[#allocation38_spill] sm:$0xff] }
  0xaf   : > { %v3033_v48 = vld [vmem:[#allocation42_spill] sm:$0xff] }
  0xb0   : > { %v986_v31 = vmul.f32 %v2556_v39, %v3033_v48 }
  0xd3   : > { %v2517_v27 = vpop.f32.mrf.mxu0 }
  0xd4   : > { %863 = vadd.xlane.f32.xlu0 %v2517_v27 }
  0xdb   : > { %v2520_v22 = vpop.f32.mrf.mxu0 }
  0xdc   : > { %865 = vadd.xlane.f32.xlu0 %v2520_v22 }
  0xdf   : > { %v2526_v41 = vpop.f32.mrf.mxu3 }
  0xe3   : > { %v2523_v46 = vpop.f32.mrf.mxu0 }
  0xe4   : > { %867 = vadd.xlane.f32.xlu1 %v2523_v46 }
  0xe7   : > { %v2531_v25 = vpop.f32.mrf.mxu3 }
  0xeb   : > { %v2528_v24 = vpop.f32.mrf.mxu0 }
  0xec   : > { %869 = vadd.xlane.f32.xlu1 %v2528_v24 }
  0xef   : > { %v2548_v19 = vpop.f32.mrf.mxu3 }
  0xf0   : > { %3028 = vst [vmem:[#allocation15_spill] sm:$0xff] %v2548_v19 }
  0xf3   : > { %v2533_v51 = vpop.f32.mrf.mxu0 }
  0xf4   : > { %887 = vadd.xlane.f32.xlu1 %v2531_v25  ;;  %871 = vadd.xlane.f32.xlu2 %v2533_v51 }
  0xf7   : > { %v2578_v33 = vpop.f32.mrf.mxu3 }
  0xfb   : > { %v2544_v44 = vpop.f32.mrf.mxu0 }
  0xfc   : > { %885 = vadd.xlane.f32.xlu2 %v2526_v41  ;;  %873 = vadd.xlane.f32.xlu0 %v2544_v44 }
 0x103   : > { %v2550_v34 = vpop.f32.mrf.mxu0 }
 0x104   : > { %889 = vadd.xlane.f32.xlu0 %v2548_v19  ;;  %875 = vadd.xlane.f32.xlu2 %v2550_v34  ;;  %v1047_v19 = vadd.f32 %v1031_v28, %v1012_v26  ;;  %v1045_v28 = vadd.f32 %v1029_v3, %v1010_v11  ;;  %v1025_v26 = vmul.f32 %v2558_v61, %v3008_v18 }
 0x105   : > { %v1024_v18 = vmul.f32 %v2558_v61, %v3024_v38  ;;  %v969_v3 = vmul.f32 %v2554_v43, %v3010_v50  ;;  %v1023_v38 = vmul.f32 %v2558_v61, %v3016_v0  ;;  %v1059_v11 = vmul.f32 %v2560_v57, %v3027_v45 }
 0x106   : > { %v1082_v36 = vadd.f32 %v1066_v54, %v1047_v19  ;;  %v1080_v58 = vadd.f32 %v1064_v7, %v1045_v28  ;;  %v1008_v19 = vadd.f32 %v992_v17, %v973_v42  ;;  %v1062_v54 = vmul.f32 %v2560_v57, %v3026_v53  ;;  %v2630_v53 = vpop.f32.mrf.mxu3 }
 0x107   : > { %v1041_v52 = vadd.f32 %v1025_v26, %v1006_v60  ;;  %v1077_v7 = vadd.f32 %v1061_v15, %v1042_v1  ;;  %v1004_v56 = vadd.f32 %v988_v59, %v969_v3  ;;  %v968_v50 = vmul.f32 %v2554_v43, %v2218_v49  ;;  %v3035_v15 = vld [vmem:[#allocation45_spill] sm:$0xff]  ;;  %v3038_v60 = vld [vmem:[#allocation47_spill] sm:$0xff] }
 0x108   : > { %1104 = vmatpush.msra.mxu1 %v1082_v36  ;;  %1618 = vmatpush.msra.mxu2 %v1082_v36  ;;  %v1043_v6 = vadd.f32 %v1027_v47, %v1008_v19  ;;  %v1040_v23 = vadd.f32 %v1024_v18, %v1005_v62  ;;  %v1058_v36 = vmul.f32 %v2560_v57, %v3030_v35  ;;  %v3032_v47 = vld [vmem:[#allocation41_spill] sm:$0xff] }
 0x109   : > { %v1076_v9 = vadd.f32 %v1060_v8, %v1041_v52  ;;  %v1039_v0 = vadd.f32 %v1023_v38, %v1004_v56  ;;  %v1003_v28 = vadd.f32 %v987_v20, %v968_v50  ;;  %v1057_v49 = vmul.f32 %v2560_v57, %v3031_v37  ;;  %v3041_v52 = vld [vmem:[#allocation48_spill] sm:$0xff]  ;;  %v3042_v38 = vld [vmem:[#allocation51_spill] sm:$0xff] }
 0x10a   : > { %1105 = vmatpush.msra.mxu1 %v1081_v40  ;;  %1619 = vmatpush.msra.mxu2 %v1081_v40  ;;  %v1078_v14 = vadd.f32 %v1062_v54, %v1043_v6  ;;  %v1075_v45 = vadd.f32 %v1059_v11, %v1040_v23  ;;  %v966_v2 = vmul.f32 %v2554_v43, %v3035_v15  ;;  %v3037_v6 = vld [vmem:[#allocation44_spill] sm:$0xff]  ;;  %v3044_v23 = vld [vmem:[#allocation53_spill] sm:$0xff] }
 0x10b   : > { %v2600_v29 = vpop.f32.mrf.mxu0  ;;  %v1038_v40 = vadd.f32 %v1022_v30, %v1003_v28  ;;  %v1074_v42 = vadd.f32 %v1058_v36, %v1039_v0  ;;  %v985_v26 = vmul.f32 %v2556_v39, %v3036_v4  ;;  %v1056_v10 = vmul.f32 %v2560_v57, %v3037_v6  ;;  %v3043_v56 = vld [vmem:[#allocation52_spill] sm:$0xff]  ;;  %v3046_v0 = vld [vmem:[#allocation55_spill] sm:$0xff]  ;;  %v3047_v36 = vld [vmem:[#allocation57_spill] sm:$0xff] }
 0x10c   : > { %891 = vadd.xlane.f32.xlu2 %v2578_v33  ;;  %877 = vadd.xlane.f32.xlu1 %v2600_v29  ;;  %v1020_v8 = vmul.f32 %v2558_v61, %v3038_v60  ;;  %v965_v18 = vmul.f32 %v2554_v43, %v3039_v16  ;;  %v1055_v62 = vmul.f32 %v2560_v57, %v3041_v52 }
 0x10d   : > { %1106 = vmatpush.msra.mxu1 %v1080_v58  ;;  %1620 = vmatpush.msra.mxu2 %v1080_v58  ;;  %v1073_v17 = vadd.f32 %v1057_v49, %v1038_v40  ;;  %v967_v58 = vmul.f32 %v2554_v43, %v3032_v47  ;;  %v1001_v12 = vadd.f32 %v985_v26, %v966_v2  ;;  %v3048_v49 = vld [vmem:[#allocation56_spill] sm:$0xff]  ;;  %v3050_v47 = vld [vmem:[#allocation59_spill] sm:$0xff] }
 0x10e   : > { %v1054_v50 = vmul.f32 %v2560_v57, %v3043_v56  ;;  %v964_v20 = vmul.f32 %v2554_v43, %v3044_v23  ;;  %v983_v30 = vmul.f32 %v2556_v39, %v3045_v5  ;;  %v1018_v35 = vmul.f32 %v2558_v61, %v3046_v0 }
 0x10f   : > { %1107 = vmatpush.msra.mxu1 %v1079_v32  ;;  %1621 = vmatpush.msra.mxu2 %v1079_v32  ;;  %v1002_v54 = vadd.f32 %v986_v31, %v967_v58  ;;  %v1036_v59 = vadd.f32 %v1020_v8, %v1001_v12  ;;  %v963_v28 = vmul.f32 %v2554_v43, %v3047_v36 }
 0x110   : > { %v999_v37 = vadd.f32 %v983_v30, %v964_v20  ;;  %v1053_v40 = vmul.f32 %v2560_v57, %v3048_v49  ;;  %v1017_v58 = vmul.f32 %v2558_v61, %v3050_v47  ;;  %v1052_v43 = vmul.f32 %v2560_v57, %v3051_v63 }
 0x111   : > { %1108 = vmatpush.msra.mxu1 %v1078_v14  ;;  %1622 = vmatpush.msra.mxu2 %v1078_v14  ;;  %v1037_v32 = vadd.f32 %v1021_v13, %v1002_v54  ;;  %v3040_v14 = vld [vmem:[#allocation50_spill] sm:$0xff] }
 0x112   : > { %v984_v1 = vmul.f32 %v2556_v39, %v3040_v14  ;;  %v1034_v31 = vadd.f32 %v1018_v35, %v999_v37 }
 0x113   : > { %v2640_v21 = vpop.f32.mrf.mxu0  ;;  %1109 = vmatpush.msra.mxu1 %v1077_v7  ;;  %1623 = vmatpush.msra.mxu2 %v1077_v7  ;;  %v1072_v3 = vadd.f32 %v1056_v10, %v1037_v32  ;;  %v1019_v7 = vmul.f32 %v2558_v61, %v3042_v38  ;;  %v2709_v32 = vstv %s1085_s13 }
 0x114   : > { %893 = vadd.xlane.f32.xlu1 %v2630_v53  ;;  %879 = vadd.xlane.f32.xlu0 %v2640_v21  ;;  %v1000_v11 = vadd.f32 %v984_v1, %v965_v18  ;;  %v1069_v13 = vadd.f32 %v1053_v40, %v1034_v31 }
 0x115   : > { %1110 = vmatpush.msra.mxu1 %v1076_v9  ;;  %1624 = vmatpush.msra.mxu2 %v1076_v9  ;;  %v1071_v9 = vadd.f32 %v1055_v62, %v1036_v59 }
 0x117   : > { %1111 = vmatpush.msra.mxu1 %v1075_v45  ;;  %1625 = vmatpush.msra.mxu2 %v1075_v45  ;;  %v1035_v45 = vadd.f32 %v1019_v7, %v1000_v11 }
 0x119   : > { %1112 = vmatpush.msra.mxu1 %v1074_v42  ;;  %1626 = vmatpush.msra.mxu2 %v1074_v42  ;;  %v3049_v42 = vld [vmem:[#allocation58_spill] sm:$0xff]  ;;  %v1070_v48 = vadd.f32 %v1054_v50, %v1035_v45 }
 0x11b   : > { %v2662_v55 = vpop.f32.mrf.mxu0  ;;  %1113 = vmatpush.msra.mxu1 %v1073_v17  ;;  %1627 = vmatpush.msra.mxu2 %v1073_v17  ;;  %v982_v17 = vmul.f32 %v2556_v39, %v3049_v42 }
 0x11c   : > { %881 = vadd.xlane.f32.xlu2 %v2662_v55 }
 0x11d   : > { %1114 = vmatpush.msra.mxu1 %v1072_v3  ;;  %1628 = vmatpush.msra.mxu2 %v1072_v3  ;;  %v998_v54 = vadd.f32 %v982_v17, %v963_v28 }
 0x11f   : > { %1115 = vmatpush.msra.mxu1 %v1071_v9  ;;  %1629 = vmatpush.msra.mxu2 %v1071_v9  ;;  %v1033_v15 = vadd.f32 %v1017_v58, %v998_v54 }
 0x121   : > { %1116 = vmatpush.msra.mxu1 %v1070_v48  ;;  %1630 = vmatpush.msra.mxu2 %v1070_v48  ;;  %v1068_v2 = vadd.f32 %v1052_v43, %v1033_v15 }
 0x123   : > { %v2669_v19 = vpop.f32.mrf.mxu0  ;;  %1117 = vmatpush.msra.mxu1 %v1069_v13  ;;  %1631 = vmatpush.msra.mxu2 %v1069_v13 }
 0x124   : > { %883 = vadd.xlane.f32.xlu0 %v2669_v19 }
 0x125   : > { %1118 = vmatpush.msra.mxu1 %v1068_v2  ;;  %1632 = vmatpush.msra.mxu2 %v1068_v2 }
 0x147   : > { %v864_v39 = vpop.xlane.xlu0 %863 }
 0x148   : > { %1704 = vrcp.f32 %v864_v39  ;;  %vm895_vm2 = vcmp.eq.f32.partialorder %v864_v39, 0.0 }
 0x14e   : > { %v1705_v61 = vpop.eup %1704 }
 0x14f   : > { %v866_v4 = vpop.xlane.xlu0 %865  ;;  %v927_v26 = vsel %vm895_vm2, 0.0, %v1705_v61 }
 0x150   : > { %1706 = vrcp.f32 %v866_v4  ;;  %v943_v57 = vmul.f32 %v927_v26, %v2517_v27  ;;  %vm896_vm3 = vcmp.eq.f32.partialorder %v866_v4, 0.0 }
 0x152   : > { %1119 = vmatmul.f32.vlgmr.msra.gmra.mxu1 %v943_v57  ;;  %v2713_v6 = vmul.f32 %v2709_v32, %v943_v57 }
 0x156   : > { %v1707_v10 = vpop.eup %1706 }
 0x157   : > { %v868_v12 = vpop.xlane.xlu1 %867  ;;  %v928_v60 = vsel %vm896_vm3, 0.0, %v1707_v10 }
 0x158   : > { %1708 = vrcp.f32 %v868_v12  ;;  %v944_v8 = vmul.f32 %v928_v60, %v2520_v22  ;;  %vm897_vm4 = vcmp.eq.f32.partialorder %v868_v12, 0.0 }
 0x15a   : > { %1122 = vmatmul.f32.gmra.mxu1 %v944_v8  ;;  %v2717_v16 = vmul.f32 %v2709_v32, %v944_v8 }
 0x15e   : > { %v1709_v18 = vpop.eup %1708 }
 0x15f   : > { %v870_v14 = vpop.xlane.xlu1 %869  ;;  %v929_v1 = vsel %vm897_vm4, 0.0, %v1709_v18 }
 0x160   : > { %1710 = vrcp.f32 %v870_v14  ;;  %v945_v27 = vmul.f32 %v929_v1, %v2523_v46  ;;  %vm898_vm5 = vcmp.eq.f32.partialorder %v870_v14, 0.0 }
 0x162   : > { %1125 = vmatmul.f32.gmra.mxu1 %v945_v27  ;;  %v2721_v3 = vmul.f32 %v2709_v32, %v945_v27 }
 0x166   : > { %v1711_v59 = vpop.eup %1710 }
 0x167   : > { %v888_v52 = vpop.xlane.xlu1 %887  ;;  %v872_v62 = vpop.xlane.xlu2 %871  ;;  %v930_v22 = vsel %vm898_vm5, 0.0, %v1711_v59 }
 0x168   : > { %1712 = vrcp.f32 %v888_v52  ;;  %v946_v38 = vmul.f32 %v930_v22, %v2528_v24  ;;  %vm907_vm6 = vcmp.eq.f32.partialorder %v888_v52, 0.0  ;;  %vm899_vm7 = vcmp.eq.f32.partialorder %v872_v62, 0.0 }
 0x169   : > { %1714 = vrcp.f32 %v872_v62 }
 0x16a   : > { %1128 = vmatmul.f32.gmra.mxu1 %v946_v38  ;;  %v2725_v7 = vmul.f32 %v2709_v32, %v946_v38 }
 0x16e   : > { %v1713_v11 = vpop.eup %1712 }
 0x16f   : > { %v1715_v46 = vpop.eup %1714  ;;  %v886_v56 = vpop.xlane.xlu2 %885  ;;  %v939_v23 = vsel %vm907_vm6, 0.0, %v1713_v11 }
 0x170   : > { %v874_v50 = vpop.xlane.xlu0 %873  ;;  %1716 = vrcp.f32 %v886_v56  ;;  %v931_v20 = vsel %vm899_vm7, 0.0, %v1715_v46  ;;  %v955_v30 = vmul.f32 %v939_v23, %v2531_v25  ;;  %vm906_vm8 = vcmp.eq.f32.partialorder %v886_v56, 0.0 }
 0x171   : > { %1718 = vrcp.f32 %v874_v50  ;;  %v947_v5 = vmul.f32 %v931_v20, %v2533_v51  ;;  %vm900_vm9 = vcmp.eq.f32.partialorder %v874_v50, 0.0 }
 0x172   : > { %v2733_v9 = vmul.f32 %v2709_v32, %v955_v30 }
 0x173   : > { %1131 = vmatmul.f32.gmra.mxu1 %v947_v5  ;;  %v2730_v24 = vmul.f32 %v2709_v32, %v947_v5 }
 0x176   : > { %v1717_v0 = vpop.eup %1716 }
 0x177   : > { %v1719_v35 = vpop.eup %1718  ;;  %v876_v28 = vpop.xlane.xlu2 %875  ;;  %v938_v45 = vsel %vm906_vm8, 0.0, %v1717_v0 }
 0x178   : > { %v890_v36 = vpop.xlane.xlu0 %889  ;;  %v932_v37 = vsel %vm900_vm9, 0.0, %v1719_v35  ;;  %v954_v25 = vmul.f32 %v938_v45, %v2526_v41  ;;  %vm901_vm11 = vcmp.eq.f32.partialorder %v876_v28, 0.0 }
 0x179   : > { %1720 = vrcp.f32 %v890_v36  ;;  %v948_v51 = vmul.f32 %v932_v37, %v2544_v44  ;;  %vm908_vm10 = vcmp.eq.f32.partialorder %v890_v36, 0.0  ;;  %v3052_v44 = vld [vmem:[#allocation15_spill] sm:$0xff] }
 0x17a   : > { %1722 = vrcp.f32 %v876_v28  ;;  %1152 = vmatmul.f32.vlgmr.msra.gmra.mxu2 %v954_v25  ;;  %v2741_v40 = vmul.f32 %v2709_v32, %v954_v25 }
 0x17b   : > { %1134 = vmatmul.f32.gmra.mxu1 %v948_v51  ;;  %v2738_v49 = vmul.f32 %v2709_v32, %v948_v51 }
 0x17f   : > { %v1721_v42 = vpop.eup %1720  ;;  %v892_v47 = vpop.xlane.xlu2 %891 }
 0x180   : > { %v1723_v17 = vpop.eup %1722  ;;  %v878_v58 = vpop.xlane.xlu1 %877  ;;  %v940_v48 = vsel %vm908_vm10, 0.0, %v1721_v42  ;;  %1724 = vrcp.f32 %v892_v47  ;;  %vm909_vm12 = vcmp.eq.f32.partialorder %v892_v47, 0.0 }
 0x181   : > { %v933_v31 = vsel %vm901_vm11, 0.0, %v1723_v17  ;;  %1726 = vrcp.f32 %v878_v58  ;;  %v956_v54 = vmul.f32 %v940_v48, %v3052_v44  ;;  %vm902_vm13 = vcmp.eq.f32.partialorder %v878_v58, 0.0 }
 0x182   : > { %v949_v41 = vmul.f32 %v933_v31, %v2550_v34  ;;  %1155 = vmatmul.f32.gmra.mxu2 %v955_v30 }
 0x183   : > { %v2749_v43 = vmul.f32 %v2709_v32, %v956_v54 }
 0x184   : > { %1137 = vmatmul.f32.gmra.mxu1 %v949_v41  ;;  %v2746_v63 = vmul.f32 %v2709_v32, %v949_v41 }
 0x186   : > { %v1725_v13 = vpop.eup %1724 }
 0x187   : > { %v1727_v15 = vpop.eup %1726  ;;  %v880_v39 = vpop.xlane.xlu0 %879  ;;  %v941_v61 = vsel %vm909_vm12, 0.0, %v1725_v13 }
 0x188   : > { %v894_v2 = vpop.xlane.xlu1 %893  ;;  %v934_v4 = vsel %vm902_vm13, 0.0, %v1727_v15  ;;  %v957_v26 = vmul.f32 %v941_v61, %v2578_v33  ;;  %vm903_vm15 = vcmp.eq.f32.partialorder %v880_v39, 0.0 }
 0x189   : > { %1728 = vrcp.f32 %v894_v2  ;;  %v950_v34 = vmul.f32 %v934_v4, %v2600_v29  ;;  %vm910_vm14 = vcmp.eq.f32.partialorder %v894_v2, 0.0 }
 0x18a   : > { %1730 = vrcp.f32 %v880_v39  ;;  %1158 = vmatmul.f32.gmra.mxu2 %v956_v54  ;;  %v1101_v10 = vmul.f32 %v2709_v32, %v957_v26 }
 0x18b   : > { %v2754_v57 = vmul.f32 %v2709_v32, %v950_v34 }
 0x18c   : > { %1140 = vmatmul.f32.gmra.mxu1 %v950_v34 }
 0x18f   : > { %v1729_v12 = vpop.eup %1728  ;;  %v882_v8 = vpop.xlane.xlu2 %881 }
 0x190   : > { %v1731_v60 = vpop.eup %1730  ;;  %v942_v18 = vsel %vm910_vm14, 0.0, %v1729_v12  ;;  %1732 = vrcp.f32 %v882_v8  ;;  %vm904_vm0 = vcmp.eq.f32.partialorder %v882_v8, 0.0 }
 0x191   : > { %v935_v14 = vsel %vm903_vm15, 0.0, %v1731_v60  ;;  %v958_v1 = vmul.f32 %v942_v18, %v2630_v53 }
 0x192   : > { %v951_v29 = vmul.f32 %v935_v14, %v2640_v21  ;;  %1161 = vmatmul.f32.gmra.mxu2 %v957_v26 }
 0x193   : > { %v1102_v33 = vmul.f32 %v2709_v32, %v958_v1 }
 0x194   : > { %1143 = vmatmul.f32.gmra.mxu1 %v951_v29  ;;  %v1095_v27 = vmul.f32 %v2709_v32, %v951_v29 }
 0x196   : > { %v1733_v59 = vpop.eup %1732 }
 0x197   : > { %v884_v52 = vpop.xlane.xlu0 %883  ;;  %v936_v62 = vsel %vm904_vm0, 0.0, %v1733_v59 }
 0x198   : > { %1734 = vrcp.f32 %v884_v52  ;;  %v952_v22 = vmul.f32 %v936_v62, %v2662_v55  ;;  %vm905_vm1 = vcmp.eq.f32.partialorder %v884_v52, 0.0 }
 0x19a   : > { %v1096_v38 = vmul.f32 %v2709_v32, %v952_v22  ;;  %1164 = vmatmul.f32.gmra.mxu2 %v958_v1 }
 0x19c   : > { %1146 = vmatmul.f32.gmra.mxu1 %v952_v22 }
 0x19e   : > { %v1735_v53 = vpop.eup %1734 }
 0x19f   : > { %v937_v21 = vsel %vm905_vm1, 0.0, %v1735_v53 }
 0x1a0   : > { %v953_v11 = vmul.f32 %v937_v21, %v2669_v19 }
 0x1a2   : > { %v1097_v46 = vmul.f32 %v2709_v32, %v953_v11 }
 0x1a4   : > { %1149 = vmatmul.f32.gmra.mxu1 %v953_v11 }
 0x1cf   : > { %v1120_v56 = vpop.f32.mrf.mxu1 }
 0x1d0   : > { %v2766_v50 = vadd.f32 %v1120_v56, %v2713_v6 }
 0x1d7   : > { %v1123_v23 = vpop.f32.mrf.mxu1 }
 0x1d8   : > { %v2769_v20 = vadd.f32 %v1123_v23, %v2717_v16 }
 0x1df   : > { %v1126_v55 = vpop.f32.mrf.mxu1 }
 0x1e0   : > { %v2772_v5 = vadd.f32 %v1126_v55, %v2721_v3 }
 0x1e7   : > { %v1129_v30 = vpop.f32.mrf.mxu1 }
 0x1e8   : > { %v2775_v0 = vadd.f32 %v1129_v30, %v2725_v7 }
 0x1f0   : > { %v1132_v19 = vpop.f32.mrf.mxu1 }
 0x1f1   : > { %v2778_v32 = vadd.f32 %v1132_v19, %v2730_v24 }
 0x1f8   : > { %v1135_v35 = vpop.f32.mrf.mxu1 }
 0x1f9   : > { %v2799_v48 = vadd.f32 %v1135_v35, %v2738_v49 }
 0x1fd   : > { %v1153_v36 = vpop.f32.mrf.mxu2 }
 0x1fe   : > { %v2781_v6 = vadd.f32 %v1153_v36, %v2741_v40 }
 0x200   : > { %1190 = vadd.xlane.f32.xlu2 %v2781_v6 }
 0x201   : > { %v1138_v28 = vpop.f32.mrf.mxu1 }
 0x202   : > { %v2810_v44 = vadd.f32 %v1138_v28, %v2746_v63 }
 0x205   : > { %v1156_v16 = vpop.f32.mrf.mxu2 }
 0x206   : > { %v2785_v3 = vadd.f32 %v1156_v16, %v2733_v9 }
 0x208   : > { %1192 = vadd.xlane.f32.xlu1 %v2785_v3 }
 0x209   : > { %v1141_v45 = vpop.f32.mrf.mxu1 }
 0x20a   : > { %v2804_v41 = vadd.f32 %v1141_v45, %v2754_v57 }
 0x20d   : > { %v1159_v7 = vpop.f32.mrf.mxu2 }
 0x20e   : > { %v2789_v37 = vadd.f32 %v1159_v7, %v2749_v43 }
 0x210   : > { %1194 = vadd.xlane.f32.xlu0 %v2789_v37 }
 0x211   : > { %v1144_v24 = vpop.f32.mrf.mxu1 }
 0x212   : > { %v2792_v17 = vadd.f32 %v1144_v24, %v1095_v27 }
 0x215   : > { %v1162_v51 = vpop.f32.mrf.mxu2 }
 0x216   : > { %v1163_v25 = vadd.f32 %v1162_v51, %v1101_v10 }
 0x218   : > { %1196 = vadd.xlane.f32.xlu2 %v1163_v25 }
 0x219   : > { %v1147_v40 = vpop.f32.mrf.mxu1 }
 0x21a   : > { %v2801_v31 = vadd.f32 %v1147_v40, %v1096_v38 }
 0x21d   : > { %v1165_v42 = vpop.f32.mrf.mxu2 }
 0x21e   : > { %v1166_v47 = vadd.f32 %v1165_v42, %v1102_v33 }
 0x220   : > { %1198 = vadd.xlane.f32.xlu1 %v1166_v47  ;;  %1184 = vadd.xlane.f32.xlu2 %v2792_v17 }
 0x221   : > { %v1150_v9 = vpop.f32.mrf.mxu1 }
 0x222   : > { %v2794_v58 = vadd.f32 %v1150_v9, %v1097_v46 }
 0x224   : > { %1188 = vadd.xlane.f32.xlu0 %v2794_v58 }
 0x228   : > { %1178 = vadd.xlane.f32.xlu2 %v2799_v48  ;;  %1186 = vadd.xlane.f32.xlu1 %v2801_v31 }
 0x22c   : > { %1182 = vadd.xlane.f32.xlu0 %v2804_v41 }
 0x230   : > { %1172 = vadd.xlane.f32.xlu2 %v2772_v5  ;;  %1180 = vadd.xlane.f32.xlu1 %v2810_v44 }
 0x234   : > { %1176 = vadd.xlane.f32.xlu0 %v2778_v32 }
 0x238   : > { %1174 = vadd.xlane.f32.xlu1 %v2775_v0 }
 0x23c   : > { %1170 = vadd.xlane.f32.xlu0 %v2769_v20 }
 0x240   : > { %1168 = vadd.xlane.f32.xlu1 %v2766_v50 }
 0x273   : > { %v1191_v49 = vpop.xlane.xlu2 %1190 }
 0x274   : > { %vm1211_vm6 = vcmp.eq.f32.partialorder %v1191_v49, 0.0 }
 0x27b   : > { %v1193_v54 = vpop.xlane.xlu1 %1192 }
 0x27c   : > { %vm1212_vm5 = vcmp.eq.f32.partialorder %v1193_v54, 0.0 }
 0x283   : > { %v1195_v13 = vpop.xlane.xlu0 %1194 }
 0x284   : > { %vm1213_vm4 = vcmp.eq.f32.partialorder %v1195_v13, 0.0 }
 0x28b   : > { %v1197_v43 = vpop.xlane.xlu2 %1196 }
 0x28c   : > { %1736 = vrcp.f32 %v1197_v43  ;;  %vm1214_vm2 = vcmp.eq.f32.partialorder %v1197_v43, 0.0  ;;  %v1269_v43 = vld [vmem:[%s2874_s3 + $0x8] sm:$0xff] }
 0x28d   : > { %1738 = vrcp.f32 %v1195_v13  ;;  %v1270_v13 = vld [vmem:[%s2874_s3 + $0x10] sm:$0xff] }
 0x292   : > { %v1737_v39 = vpop.eup %1736 }
 0x293   : > { %v1199_v63 = vpop.xlane.xlu1 %1198  ;;  %v1185_v15 = vpop.xlane.xlu2 %1184  ;;  %v1246_v57 = vsel %vm1214_vm2, 0.0, %v1737_v39  ;;  %v1338_v39 = vld [vmem:[#allocation9 + $0x68] sm:$0xff]  ;;  %vm1374_vm2 = vcmask 261120  }
 0x294   : > { %1740 = vrcp.f32 %v1199_v63  ;;  %v1739_v61 = vpop.eup %1738  ;;  %vm1215_vm3 = vcmp.eq.f32.partialorder %v1199_v63, 0.0  ;;  %v1262_v1 = vmul.f32 %v1246_v57, %v1163_v25  ;;  %vm1208_vm9 = vcmp.eq.f32.partialorder %v1185_v15, 0.0  ;;  %v1335_v57 = vld [vmem:[#allocation9 + $0x50] sm:$0xff] }
 0x295   : > { %1742 = vrcp.f32 %v1193_v54  ;;  %v1245_v18 = vsel %vm1213_vm4, 0.0, %v1739_v61 }
 0x296   : > { %1744 = vrcp.f32 %v1191_v49  ;;  %v1261_v27 = vmul.f32 %v1245_v18, %v2789_v37  ;;  %v1266_v18 = vld [vmem:[#allocation7 + $0x10] sm:$0xff] }
 0x297   : > { %v1189_v2 = vpop.xlane.xlu0 %1188 }
 0x298   : > { %1746 = vrcp.f32 %v1189_v2  ;;  %vm1210_vm7 = vcmp.eq.f32.partialorder %v1189_v2, 0.0 }
 0x29a   : > { %v1741_v4 = vpop.eup %1740 }
 0x29b   : > { %v1187_v34 = vpop.xlane.xlu1 %1186  ;;  %v1247_v26 = vsel %vm1215_vm3, 0.0, %v1741_v4  ;;  %v1743_v10 = vpop.eup %1742  ;;  %v1264_v4 = vld [vmem:[#allocation7] sm:$0xff] }
 0x29c   : > { %1748 = vrcp.f32 %v1187_v34  ;;  %v1263_v12 = vmul.f32 %v1247_v26, %v1166_v47  ;;  %v1179_v60 = vpop.xlane.xlu2 %1178  ;;  %v1745_v14 = vpop.eup %1744  ;;  %v1244_v29 = vsel %vm1212_vm5, 0.0, %v1743_v10  ;;  %vm1209_vm8 = vcmp.eq.f32.partialorder %v1187_v34, 0.0  ;;  %v1337_v34 = vld [vmem:[#allocation9 + $0x60] sm:$0xff]  ;;  %v1336_v26 = vld [vmem:[#allocation9 + $0x58] sm:$0xff]  ;;  %v1334_v10 = vld [vmem:[#allocation9 + $0x48] sm:$0xff] }
 0x29d   : > { %1750 = vrcp.f32 %v1185_v15  ;;  %v1243_v59 = vsel %vm1211_vm6, 0.0, %v1745_v14  ;;  %v1260_v62 = vmul.f32 %v1244_v29, %v2785_v3  ;;  %vm1205_vm12 = vcmp.eq.f32.partialorder %v1179_v60, 0.0  ;;  %v1267_v14 = vld [vmem:[#allocation7 + $0x18] sm:$0xff]  ;;  %v1329_v29 = vld [vmem:[#allocation9 + $0x20] sm:$0xff] }
 0x29e   : > { %1292 = vmatpush.msrb.mxu2 %v1263_v12  ;;  %v1747_v33 = vpop.eup %1746  ;;  %v1259_v21 = vmul.f32 %v1243_v59, %v2781_v6  ;;  %v1265_v12 = vld [vmem:[#allocation7 + $0x8] sm:$0xff] }
 0x29f   : > { %v1183_v8 = vpop.xlane.xlu0 %1182  ;;  %v1242_v38 = vsel %vm1210_vm7, 0.0, %v1747_v33  ;;  %v1328_v33 = vld [vmem:[#allocation9 + $0x18] sm:$0xff]  ;;  %v1326_v59 = vld [vmem:[#allocation9 + $0x8] sm:$0xff] }
 0x2a0   : > { %1752 = vrcp.f32 %v1183_v8  ;;  %1293 = vmatpush.msrb.mxu2 %v1262_v1  ;;  %v1258_v23 = vmul.f32 %v1242_v38, %v2794_v58  ;;  %vm1207_vm10 = vcmp.eq.f32.partialorder %v1183_v8, 0.0  ;;  %v1331_v8 = vld [vmem:[#allocation9 + $0x30] sm:$0xff]  ;;  %v1330_v1 = vld [vmem:[#allocation9 + $0x28] sm:$0xff] }
 0x2a1   : > { %1754 = vrcp.f32 %v1179_v60  ;;  %v1333_v60 = vld [vmem:[#allocation9 + $0x40] sm:$0xff] }
 0x2a2   : > { %v1749_v52 = vpop.eup %1748  ;;  %1294 = vmatpush.msrb.mxu2 %v1261_v27  ;;  %v1327_v27 = vld [vmem:[#allocation9 + $0x10] sm:$0xff] }
 0x2a3   : > { %v1181_v22 = vpop.xlane.xlu1 %1180  ;;  %v1751_v53 = vpop.eup %1750  ;;  %v1241_v46 = vsel %vm1209_vm8, 0.0, %v1749_v52  ;;  %v1325_v52 = vld [vmem:[#allocation9] sm:$0xff] }
 0x2a4   : > { %1756 = vrcp.f32 %v1181_v22  ;;  %1295 = vmatpush.msrb.mxu2 %v1260_v62  ;;  %v1173_v55 = vpop.xlane.xlu2 %1172  ;;  %v1240_v30 = vsel %vm1208_vm9, 0.0, %v1751_v53  ;;  %v1257_v19 = vmul.f32 %v1241_v46, %v2801_v31  ;;  %vm1206_vm11 = vcmp.eq.f32.partialorder %v1181_v22, 0.0 }
 0x2a5   : > { %v1256_v6 = vmul.f32 %v1240_v30, %v2792_v17  ;;  %v1934_v17 = vmov 0   ;;  %vm1202_vm14 = vcmp.eq.f32.partialorder %v1173_v55, 0.0 }
 0x2a6   : > { %v1753_v56 = vpop.eup %1752  ;;  %1296 = vmatpush.msrb.mxu2 %v1259_v21  ;;  %1702 = vset.pattern.permute.xlu0 %v1934_v17 }
 0x2a7   : > { %v1177_v11 = vpop.xlane.xlu0 %1176  ;;  %v1755_v35 = vpop.eup %1754  ;;  %v1239_v36 = vsel %vm1207_vm10, 0.0, %v1753_v56  ;;  %1703 = vset.pattern.permute.xlu1 %v1934_v17  ;;  %1701 = vset.pattern.permute.xlu2 %v1934_v17 }
 0x2a8   : > { %1758 = vrcp.f32 %v1177_v11  ;;  %1297 = vmatpush.msrb.mxu2 %v1258_v23  ;;  %v1255_v7 = vmul.f32 %v1239_v36, %v2804_v41  ;;  %v1237_v24 = vsel %vm1205_vm12, 0.0, %v1755_v35  ;;  %vm1204_vm13 = vcmp.eq.f32.partialorder %v1177_v11, 0.0  ;;  %1279 = vperm.xlu0 %1702, %v1269_v43  }
 0x2a9   : > { %1760 = vrcp.f32 %v1173_v55  ;;  %v1253_v42 = vmul.f32 %v1237_v24, %v2799_v48  ;;  %1284 = vperm.xlu1 %1703, %v1270_v13   ;;  %v1372_v24 = vld [vmem:[%s328_s29 + $0x10] sm:$0xff] }
 0x2aa   : > { %v1757_v28 = vpop.eup %1756  ;;  %1298 = vmatpush.msrb.mxu2 %v1257_v19 }
 0x2ab   : > { %v1175_v16 = vpop.xlane.xlu1 %1174  ;;  %v1238_v3 = vsel %vm1206_vm11, 0.0, %v1757_v28 }
 0x2ac   : > { %1762 = vrcp.f32 %v1175_v16  ;;  %1299 = vmatpush.msrb.mxu2 %v1256_v6  ;;  %v1254_v51 = vmul.f32 %v1238_v3, %v2810_v44  ;;  %vm1203_vm15 = vcmp.eq.f32.partialorder %v1175_v16, 0.0 }
 0x2ae   : > { %v1759_v45 = vpop.eup %1758  ;;  %1300 = vmatpush.msrb.mxu2 %v1255_v7 }
 0x2af   : > { %v1171_v37 = vpop.xlane.xlu0 %1170  ;;  %v1236_v25 = vsel %vm1204_vm13, 0.0, %v1759_v45  ;;  %v1761_v40 = vpop.eup %1760 }
 0x2b0   : > { %1764 = vrcp.f32 %v1171_v37  ;;  %1301 = vmatpush.msrb.mxu2 %v1254_v51  ;;  %v1252_v9 = vmul.f32 %v1236_v25, %v2778_v32  ;;  %v1234_v41 = vsel %vm1202_vm14, 0.0, %v1761_v40  ;;  %vm1201_vm0 = vcmp.eq.f32.partialorder %v1171_v37, 0.0  ;;  %v1268_v32 = vld [vmem:[%s2874_s3] sm:$0xff]  ;;  %v1371_v51 = vld [vmem:[%s328_s29 + $0x8] sm:$0xff]  ;;  %v1373_v25 = vld [vmem:[%s328_s29 + $0x18] sm:$0xff] }
 0x2b1   : > { %v1250_v54 = vmul.f32 %v1234_v41, %v2772_v5  ;;  %1274 = vperm.xlu2 %1701, %v1268_v32   ;;  %v1339_v5 = vld [vmem:[#allocation9 + $0x70] sm:$0xff]  ;;  %v1370_v37 = vld [vmem:[%s328_s29] sm:$0xff] }
 0x2b2   : > { %v1763_v47 = vpop.eup %1762  ;;  %1302 = vmatpush.msrb.mxu2 %v1253_v42 }
 0x2b3   : > { %v1169_v58 = vpop.xlane.xlu1 %1168  ;;  %v1235_v31 = vsel %vm1203_vm15, 0.0, %v1763_v47 }
 0x2b4   : > { %1766 = vrcp.f32 %v1169_v58  ;;  %1303 = vmatpush.msrb.mxu2 %v1252_v9  ;;  %v1251_v44 = vmul.f32 %v1235_v31, %v2775_v0  ;;  %v1340_v0 = vld [vmem:[#allocation9 + $0x78] sm:$0xff]  ;;  %vm1200_vm1 = vcmp.eq.f32.partialorder %v1169_v58, 0.0 }
 0x2b5   : > { %1341 = vmatpush.msrb.mxu3 %v1340_v0 }
 0x2b6   : > { %v1765_v49 = vpop.eup %1764  ;;  %1304 = vmatpush.msrb.mxu2 %v1251_v44 }
 0x2b7   : > { %v1233_v48 = vsel %vm1201_vm0, 0.0, %v1765_v49  ;;  %1342 = vmatpush.msrb.mxu3 %v1339_v5 }
 0x2b8   : > { %1305 = vmatpush.msrb.mxu2 %v1250_v54  ;;  %v1249_v63 = vmul.f32 %v1233_v48, %v2769_v20  ;;  %v1271_v20 = vld [vmem:[%s2874_s3 + $0x18] sm:$0xff] }
 0x2b9   : > { %1343 = vmatpush.msrb.mxu3 %v1338_v39  ;;  %1289 = vperm.xlu2 %1701, %v1271_v20  }
 0x2ba   : > { %v1767_v15 = vpop.eup %1766  ;;  %1306 = vmatpush.msrb.mxu2 %v1249_v63 }
 0x2bb   : > { %v1232_v2 = vsel %vm1200_vm1, 0.0, %v1767_v15  ;;  %1344 = vmatpush.msrb.mxu3 %v1337_v34 }
 0x2bc   : > { %v1248_v61 = vmul.f32 %v1232_v2, %v2766_v50  ;;  %v1332_v50 = vld [vmem:[#allocation9 + $0x38] sm:$0xff] }
 0x2bd   : > { %1345 = vmatpush.msrb.mxu3 %v1336_v26 }
 0x2be   : > { %1307 = vmatpush.msrb.mxu2 %v1248_v61 }
 0x2bf   : > { %1308 = vmatmul.f32.vlgmr.msrb.gmra.mxu2 %v1264_v4  ;;  %1346 = vmatpush.msrb.mxu3 %v1335_v57 }
 0x2c1   : > { %1347 = vmatpush.msrb.mxu3 %v1334_v10 }
 0x2c3   : > { %1348 = vmatpush.msrb.mxu3 %v1333_v60 }
 0x2c5   : > { %1349 = vmatpush.msrb.mxu3 %v1332_v50 }
 0x2c7   : > { %1311 = vmatmul.f32.gmra.mxu2 %v1265_v12  ;;  %1350 = vmatpush.msrb.mxu3 %v1331_v8 }
 0x2c9   : > { %1351 = vmatpush.msrb.mxu3 %v1330_v1 }
 0x2cb   : > { %1352 = vmatpush.msrb.mxu3 %v1329_v29 }
 0x2cd   : > { %1353 = vmatpush.msrb.mxu3 %v1328_v33 }
 0x2cf   : > { %1314 = vmatmul.f32.gmra.mxu2 %v1266_v18  ;;  %1354 = vmatpush.msrb.mxu3 %v1327_v27 }
 0x2d1   : > { %1355 = vmatpush.msrb.mxu3 %v1326_v59 }
 0x2d3   : > { %1356 = vmatpush.msrb.mxu3 %v1325_v52 }
 0x2d7   : > { %1317 = vmatmul.f32.gmra.mxu2 %v1267_v14 }
 0x30b   : > { %v1275_v62 = vpop.permute.xlu2 %1274 }
 0x313   : > { %v1290_v35 = vpop.permute.xlu2 %1289 }
 0x31a   : > { %v1280_v21 = vpop.permute.xlu0 %1279 }
 0x31b   : > { %v1285_v23 = vpop.permute.xlu1 %1284 }
 0x342   : > { %v1309_v22 = vpop.f32.mrf.mxu2 }
 0x343   : > { %v1310_v38 = vadd.f32 %v1309_v22, %v1275_v62 }
 0x345   : > { %v1321_v53 = vmax.f32 %v1310_v38, 0.0 }
 0x347   : > { %1357 = vmatmul.f32.vlgmr.msrb.gmra.mxu3 %v1321_v53 }
 0x34a   : > { %v1312_v11 = vpop.f32.mrf.mxu2 }
 0x34b   : > { %v1313_v46 = vadd.f32 %v1312_v11, %v1280_v21 }
 0x34d   : > { %v1322_v56 = vmax.f32 %v1313_v46, 0.0 }
 0x34f   : > { %1360 = vmatmul.f32.gmra.mxu3 %v1322_v56 }
 0x352   : > { %v1315_v55 = vpop.f32.mrf.mxu2 }
 0x353   : > { %v1316_v30 = vadd.f32 %v1315_v55, %v1285_v23 }
 0x355   : > { %v1323_v19 = vmax.f32 %v1316_v30, 0.0 }
 0x357   : > { %1363 = vmatmul.f32.gmra.mxu3 %v1323_v19 }
 0x35a   : > { %v1318_v36 = vpop.f32.mrf.mxu2 }
 0x35b   : > { %v1319_v28 = vadd.f32 %v1318_v36, %v1290_v35 }
 0x35d   : > { %v1324_v6 = vmax.f32 %v1319_v28, 0.0 }
 0x35f   : > { %1366 = vmatmul.f32.gmra.mxu3 %v1324_v6 }
 0x3ca   : > { %v1358_v16 = vpop.f32.mrf.mxu3 }
 0x3d2   : > { %v1361_v3 = vpop.f32.mrf.mxu3 }
 0x3da   : > { %v1364_v45 = vpop.f32.mrf.mxu3 }
 0x3e2   : > { %v1367_v7 = vpop.f32.mrf.mxu3 }
 0x3e3   : > { %1399 = vmatpush.msra.mxu2 %v1367_v7  ;;  %1633 = vmatpush.msra.mxu3 %v1367_v7 }
 0x3e5   : > { %1400 = vmatpush.msra.mxu2 %v1364_v45  ;;  %1634 = vmatpush.msra.mxu3 %v1364_v45 }
 0x3e7   : > { %1401 = vmatpush.msra.mxu2 %v1361_v3  ;;  %1635 = vmatpush.msra.mxu3 %v1361_v3 }
 0x3e9   : > { %1402 = vmatpush.msra.mxu2 %v1358_v16  ;;  %1636 = vmatpush.msra.mxu3 %v1358_v16 }
 0x3ea   : > { %1586 = vmatmul.msk.f32.vlgmr.msra.gmra.mxu2 %vm1374_vm2, %v1370_v37  ;;  %1588 = vmatmul.msk.f32.vlgmr.msra.gmra.mxu3 %vm1374_vm2, %v1372_v24 }
 0x3f2   : > { %1587 = vmatmul.msk.f32.gmra.mxu2 %vm1374_vm2, %v1371_v51  ;;  %1589 = vmatmul.msk.f32.gmra.mxu3 %vm1374_vm2, %v1373_v25 }
 0x46d   : > { %v1404_v40 = vpop.f32.mrf.mxu2  ;;  %v1410_v42 = vpop.f32.mrf.mxu3 }
 0x471   : > { %1419 = sbr.rel (%p1571_p2) target bundleno = 1147 (0x47b), region = 68 }
 0x475   : > { %v1407_v17 = vpop.f32.mrf.mxu2  ;;  %v1413_v47 = vpop.f32.mrf.mxu3 }
 0x476   : > { %v1935_v9 = vmov 0.0  }
 0x477   : > { %1420 = vst [vmem:[#allocation10] sm:$0xff] %v1935_v9 }
 0x478   : > { %1421 = vst [vmem:[#allocation10 + $0x8] sm:$0xff] %v1935_v9 }
 0x479   : > { %1422 = vst [vmem:[#allocation10 + $0x10] sm:$0xff] %v1935_v9 }
 0x47a   : > { %1423 = vst [vmem:[#allocation10 + $0x18] sm:$0xff] %v1935_v9 }
 0x47b PF: > { %p1591_p8 = scmp.ne.s32.totalorder %s1986_s25, 1 }
 0x47e   : > { %v1424_v58 = vld [vmem:[#allocation10] sm:$0xff] }
 0x47f   : > { %v1425_v31 = vld [vmem:[#allocation10 + $0x8] sm:$0xff]  ;;  %v1428_v49 = vadd.f32 %v1424_v58, %v1404_v40 }
 0x480   : > { %v1426_v41 = vld [vmem:[#allocation10 + $0x10] sm:$0xff]  ;;  %v1429_v44 = vadd.f32 %v1425_v31, %v1407_v17  ;;  %1439 = sbr.rel (%p1591_p8) target bundleno = 1286 (0x506), region = 72 }
 0x481   : > { %v1430_v48 = vadd.f32 %v1426_v41, %v1410_v42  ;;  %v1427_v54 = vld [vmem:[#allocation10 + $0x18] sm:$0xff]  ;;  %1432 = vst [vmem:[#allocation10] sm:$0xff] %v1428_v49 }
 0x482   : > { %v1431_v43 = vadd.f32 %v1427_v54, %v1413_v47  ;;  %1433 = vst [vmem:[#allocation10 + $0x8] sm:$0xff] %v1429_v44 }
 0x483   : > { %1434 = vst [vmem:[#allocation10 + $0x10] sm:$0xff] %v1430_v48 }
 0x484   : > { %1435 = vst [vmem:[#allocation10 + $0x18] sm:$0xff] %v1431_v43 }
 0x485   : > { %v1446_v32 = vld [vmem:[%s2877_s6 + $0x10] sm:$0xff]  ;;  %v1444_v13 = vld [vmem:[%s2877_s6] sm:$0xff]  ;;  %v1936_v63 = vmov 0   ;;  %v1447_v0 = vld [vmem:[%s2877_s6 + $0x18] sm:$0xff] }
 0x486   : > { %1769 = vset.pattern.permute.xlu1 %v1936_v63  ;;  %1768 = vset.pattern.permute.xlu0 %v1936_v63  ;;  %v1445_v5 = vld [vmem:[%s2877_s6 + $0x8] sm:$0xff] }
 0x487   : > { %1460 = vperm.xlu1 %1769, %v1446_v32   ;;  %1450 = vperm.xlu0 %1768, %v1444_v13  }
 0x488   : > { %v1440_v2 = vld [vmem:[#allocation10] sm:$0xff] }
 0x489   : > { %v1441_v26 = vld [vmem:[#allocation10 + $0x8] sm:$0xff] }
 0x48a   : > { %v1442_v15 = vld [vmem:[#allocation10 + $0x10] sm:$0xff] }
 0x48b   : > { %v1443_v20 = vld [vmem:[#allocation10 + $0x18] sm:$0xff] }
 0x48f   : > { %1465 = vperm.xlu1 %1769, %v1447_v0   ;;  %1455 = vperm.xlu0 %1768, %v1445_v5  }
 0x4f9   : > { %v1461_v39 = vpop.permute.xlu1 %1460  ;;  %v1451_v61 = vpop.permute.xlu0 %1450 }
 0x4fa   : > { %v1470_v4 = vadd.f32 %v1461_v39, %v1442_v15  ;;  %v1468_v34 = vadd.f32 %v1451_v61, %v1440_v2 }
 0x4fc   : > { %1474 = vst [vmem:[#allocation10 + $0x10] sm:$0xff] %v1470_v4 }
 0x4fd   : > { %1472 = vst [vmem:[#allocation10] sm:$0xff] %v1468_v34 }
 0x501   : > { %v1466_v57 = vpop.permute.xlu1 %1465  ;;  %v1456_v10 = vpop.permute.xlu0 %1455 }
 0x502   : > { %v1471_v12 = vadd.f32 %v1466_v57, %v1443_v20  ;;  %v1469_v60 = vadd.f32 %v1456_v10, %v1441_v26 }
 0x504   : > { %1475 = vst [vmem:[#allocation10 + $0x18] sm:$0xff] %v1471_v12 }
 0x505   : > { %1473 = vst [vmem:[#allocation10 + $0x8] sm:$0xff] %v1469_v60 }
 0x506 PF: > { %p1678_p9 = scmp.eq.s32.totalorder %s1986_s25, 1  ;;  %s1937_s14 = smov [#allocation10]  }
 0x507   : > { %s1481_s15 = sshll.u32 %s1937_s14, 4  ;;  %s1483_s18 = sshll.u32 %s2878_s7, 4  ;;  %s1482_s15 = int_to_ptr.vmem [resolvable:$true] %s1481_s15  ;;  %s1484_s18 = int_to_ptr.hbm [resolvable:$true] %s1483_s18 }
 0x508   : > { %s1938_s19 = smov 128   ;;  %s1939_s20 = smov 8  }
 0x509   : > { %1654 = dma.vmem_to_hbm [thread:$0]  (%p1678_p9), %s1482_s15, 512, %s1484_s18, [#allocation4], %s1938_s19, %s1938_s19, %s1939_s20  }
 0x50a   : > { %1920 = dma.done.wait (%p1678_p9), [#allocation4], 512  }
 0x50b   : > { %1922 = vsyncadd (%p1678_p9), [#allocation4], 4294966784 }
 0x50c PF: > { %s21_s24 = sadd.s32 1, %s1925_s24  }
 0x50d   : > { %p18_p10 = scmp.ge.s32.totalorder %s21_s24, 4  }
 0x50f   :  { %20 = sbr.rel (!%p18_p10) target bundleno = 4 (0x4), region = 104 }
 0x514   :  { %1500 = vsyncpa [#allocation3], 1 }
 0x515   :  { %1502 = vsyncpa [#allocation3 + $0x1], 1 }
 0x516   :  { %1503 = vsyncpa [#allocation8], 1 }
 0x517   :  { %1504 = vsyncpa [#allocation4], 1 }
 0x518   :  { %1506 = vsyncpa [#allocation4 + $0x1], 1 }
 0x519   :  { %1507 = vsyncpa [#allocation5], 1 }
 0x51a   :  { %1509 = vsyncpa [#allocation5 + $0x1], 1 }

</bundles_post_ra>
